<compile_context>
chip_gen: v5e
topology: v5e:2x2
jax: 0.10.0
libtpu: 0.0.40
codegen_flags: <defaults>
</compile_context>

<pallas_src>
import functools

import jax
import jax.numpy as jnp
from jax.experimental import pallas as pl
from jax.experimental.pallas import tpu as pltpu

_MIB = 1024 * 1024
_LANE = 128
_TARGET_BLOCK_BYTES = 4 * _MIB    # upper end of the measured 1-4 MiB sweet spot
_MIN_BLOCK_BYTES = 1 * _MIB       # DMA-efficiency floor (~85% of HBM roofline)
_MIN_GRID_STEPS = 8               # >= 4 steps per TensorCore on a 2-TC (v7x) chip


def _se_kernel(x_ref, w1t_ref, b1_ref, w2t_ref, b2_ref, o_ref, *, inv_t):
    """One grid step: a (Bb, C, Tp) slab of the batch."""
    x = x_ref[...]                                    # (Bb, C, Tp), input dtype

    # Squeeze: global average pool over T, accumulated in f32.
    # inv_t = 1 / original_T (zero-padding along T keeps the sum exact).
    y = jnp.sum(x, axis=-1, dtype=jnp.float32) * inv_t                               # (Bb, C)

    # Excitation: batched, lane-dense matmuls on the MXU.
    h = jnp.dot(y, w1t_ref[...], preferred_element_type=jnp.float32) + b1_ref[...]   # (Bb, H)
    h = jnp.maximum(h, 0.0)                                                           # ReLU
    s = jnp.dot(h, w2t_ref[...], preferred_element_type=jnp.float32) + b2_ref[...]   # (Bb, C)
    s = jax.nn.sigmoid(s)

    # Scale: multiply in the input dtype, broadcasting (Bb, C, 1) over T.
    o_ref[...] = (x * s.astype(x.dtype)[:, :, None]).astype(o_ref.dtype)


def _vmem_limit_bytes():
    """Generation-aware scoped-VMEM limit: ~half of physical, clamped to [32, 64] MiB."""
    try:
        cap = int(getattr(pltpu.get_tpu_info(), "vmem_capacity_bytes", 0))
    except Exception:
        cap = 0
    if cap <= 0:
        return 32 * _MIB                      # safe on every generation (incl. v7x)
    return int(min(max(cap // 2, 32 * _MIB), 64 * _MIB))


def _pick_block_b(B, bytes_per_row, vmem_limit):
    """Pick Bb: blocks in ~[1, 4] MiB, >= 8 grid steps when possible, VMEM-safe always."""
    # in + out blocks, each double-buffered by the pipeline -> ~4 resident copies,
    # plus weights/biases/compiler scratch headroom.
    block_budget = max(_MIN_BLOCK_BYTES, (vmem_limit - 4 * _MIB) // 5)
    bb_vmem = max(1, block_budget // bytes_per_row)          # hard VMEM cap
    bb_hi = max(1, _TARGET_BLOCK_BYTES // bytes_per_row)     # ~4 MiB block
    bb_lo = max(1, _MIN_BLOCK_BYTES // bytes_per_row)        # ~1 MiB block
    bb_steps = max(1, B // _MIN_GRID_STEPS)                  # keep >= ~8 steps

    upper = min(bb_vmem, bb_hi)
    lower = min(upper, bb_lo)
    bb = min(upper, max(bb_steps, lower))     # shrink toward >=8 steps, not below ~1 MiB
    return max(1, min(bb, B))


def se_block(x, w1, b1, w2, b2):
    """Squeeze-and-Excitation forward.

    x: (B, C, T); w1: (H, C); b1: (H,) or (H, 1); w2: (C, H); b2: (C,) or (C, 1).
    Parameters are in PyTorch nn.Linear layout; layout plumbing (weight
    transpose, lane-dense biases, B/T padding) happens in the wrapper.
    """
    B, C, T = x.shape
    H = w1.shape[0]

    w1t = jnp.transpose(w1)            # (C, H)
    w2t = jnp.transpose(w2)            # (H, C)
    b1r = jnp.reshape(b1, (1, H))      # lane-dense bias
    b2r = jnp.reshape(b2, (1, C))      # lane-dense bias

    # Lane-dense output stores: pad T up to a multiple of 128. Zero padding
    # keeps the squeeze-sum exact; the kernel divides by the original T.
    Tp = ((T + _LANE - 1) // _LANE) * _LANE

    vmem_limit = _vmem_limit_bytes()
    bytes_per_row = C * Tp * jnp.dtype(x.dtype).itemsize
    bb = _pick_block_b(B, bytes_per_row, vmem_limit)

    # Pad B to a multiple of Bb so prime / non-divisible B does not degrade to
    # Bb=1; padded rows are zeros and are sliced off afterward.
    Bp = ((B + bb - 1) // bb) * bb

    xp = x
    if Bp != B or Tp != T:
        xp = jnp.pad(x, ((0, Bp - B), (0, 0), (0, Tp - T)))

    grid = (Bp // bb,)
    kernel = functools.partial(_se_kernel, inv_t=1.0 / float(T))

    out = pl.pallas_call(
        kernel,
        out_shape=jax.ShapeDtypeStruct((Bp, C, Tp), x.dtype),
        grid_spec=pltpu.PrefetchScalarGridSpec(
            num_scalar_prefetch=0,
            grid=grid,
            in_specs=[
                pl.BlockSpec((bb, C, Tp), lambda i: (i, 0, 0)),   # x: Bb rows per step
                pl.BlockSpec((C, H), lambda i: (0, 0)),           # fc1 weight (pre-transposed)
                pl.BlockSpec((1, H), lambda i: (0, 0)),           # fc1 bias (lane-dense)
                pl.BlockSpec((H, C), lambda i: (0, 0)),           # fc2 weight (pre-transposed)
                pl.BlockSpec((1, C), lambda i: (0, 0)),           # fc2 bias (lane-dense)
            ],
            out_specs=pl.BlockSpec((bb, C, Tp), lambda i: (i, 0, 0)),
        ),
        compiler_params=pltpu.CompilerParams(
            dimension_semantics=("parallel",),
            vmem_limit_bytes=vmem_limit,
        ),
    )(xp, w1t, b1r, w2t, b2r)

    if Bp != B or Tp != T:
        out = out[:B, :, :T]
    return out


def se_block_ref(x, w1, b1, w2, b2):
    """Pure-JAX reference mirroring the PyTorch forward."""
    y = jnp.mean(x, axis=-1)                                          # (B, C)
    h = jnp.maximum(y @ w1.T + jnp.reshape(b1, (1, -1)), 0.0)         # (B, H)
    s = jax.nn.sigmoid(h @ w2.T + jnp.reshape(b2, (1, -1)))           # (B, C)
    return x * s[:, :, None]


if __name__ == "__main__":
    B, C, T = 8, 64, 200          # T not a multiple of 128 -> exercises the pad/slice path
    reduction = 16
    H = C // reduction            # hidden = 4

    key = jax.random.PRNGKey(0)
    kx, k1, k2, k3, k4 = jax.random.split(key, 5)

    x = jax.random.normal(kx, (B, C, T), dtype=jnp.float32)
    # nn.Linear layout: weight (out, in), bias (out,)
    w1 = jax.random.normal(k1, (H, C), dtype=jnp.float32) * 0.1
    b1 = jax.random.normal(k2, (H,), dtype=jnp.float32) * 0.1
    w2 = jax.random.normal(k3, (C, H), dtype=jnp.float32) * 0.1
    b2 = jax.random.normal(k4, (C,), dtype=jnp.float32) * 0.1

    out = se_block(x, w1, b1, w2, b2)
    out = jax.block_until_ready(out)

    ref = se_block_ref(x, w1, b1, w2, b2)
    assert out.shape == (B, C, T)
    assert jnp.allclose(out, ref, atol=1e-4, rtol=1e-4), "mismatch vs reference"

    print("KERNEL_OK")
</pallas_src>

<mosaic_0001>
module attributes {stable_mosaic.version = 11 : i64} {
  func.func @_se_kernel(%arg0: i32, %arg1: memref<8x64x256xf32, #tpu.memory_space<vmem>>, %arg2: memref<64x4xf32, #tpu.memory_space<vmem>>, %arg3: memref<1x4xf32, #tpu.memory_space<vmem>>, %arg4: memref<4x64xf32, #tpu.memory_space<vmem>>, %arg5: memref<1x64xf32, #tpu.memory_space<vmem>>, %arg6: memref<8x64x256xf32, #tpu.memory_space<vmem>>) attributes {dimension_semantics = [#tpu.dimension_semantics<parallel>], iteration_bounds = array<i64: 1>, scalar_prefetch = 0 : i64, scratch_operands = 0 : i64, tpu.core_type = #tpu.core_type<tc>, window_params = [{transform_indices = @transform_0, window_bounds = array<i64: 8, 64, 256>}, {pipeline_mode = #tpu.pipeline_mode<synchronous>, transform_indices = @transform_1, window_bounds = array<i64: 64, 4>}, {pipeline_mode = #tpu.pipeline_mode<synchronous>, transform_indices = @transform_2, window_bounds = array<i64: 1, 4>}, {pipeline_mode = #tpu.pipeline_mode<synchronous>, transform_indices = @transform_3, window_bounds = array<i64: 4, 64>}, {pipeline_mode = #tpu.pipeline_mode<synchronous>, transform_indices = @transform_4, window_bounds = array<i64: 1, 64>}, {transform_indices = @transform_5, window_bounds = array<i64: 8, 64, 256>}]} {
    %c0 = arith.constant 0 : index
    %c0_0 = arith.constant 0 : index
    %c0_1 = arith.constant 0 : index
    %0 = vector.load %arg1[%c0, %c0_0, %c0_1] : memref<8x64x256xf32, #tpu.memory_space<vmem>>, vector<8x64x256xf32>
    %cst = arith.constant dense<0.000000e+00> : vector<8x64xf32>
    %1 = vector.multi_reduction <add>, %0, %cst [2] : vector<8x64x256xf32> to vector<8x64xf32>
    %cst_2 = arith.constant 5.000000e-03 : f32
    %2 = vector.broadcast %cst_2 : f32 to vector<8x64xf32>
    %3 = arith.mulf %1, %2 : vector<8x64xf32>
    %c0_3 = arith.constant 0 : index
    %c0_4 = arith.constant 0 : index
    %4 = vector.load %arg2[%c0_3, %c0_4] : memref<64x4xf32, #tpu.memory_space<vmem>>, vector<64x4xf32>
    %cst_5 = arith.constant dense<0.000000e+00> : vector<8x4xf32>
    %5 = tpu.matmul %3, %4, %cst_5 {dimension_numbers = #tpu.dot_dimension_numbers<[1], [0], [0], [1], [0, 0, 1, 1], [], []>} : vector<8x64xf32>, vector<64x4xf32>, vector<8x4xf32> -> vector<8x4xf32>
    %c0_6 = arith.constant 0 : index
    %c0_7 = arith.constant 0 : index
    %6 = vector.load %arg3[%c0_6, %c0_7] : memref<1x4xf32, #tpu.memory_space<vmem>>, vector<1x4xf32>
    %7 = vector.broadcast %6 : vector<1x4xf32> to vector<8x4xf32>
    %8 = arith.addf %5, %7 : vector<8x4xf32>
    %cst_8 = arith.constant 0.000000e+00 : f32
    %9 = vector.broadcast %cst_8 : f32 to vector<8x4xf32>
    %10 = arith.maximumf %8, %9 : vector<8x4xf32>
    %c0_9 = arith.constant 0 : index
    %c0_10 = arith.constant 0 : index
    %11 = vector.load %arg4[%c0_9, %c0_10] : memref<4x64xf32, #tpu.memory_space<vmem>>, vector<4x64xf32>
    %cst_11 = arith.constant dense<0.000000e+00> : vector<8x64xf32>
    %12 = tpu.matmul %10, %11, %cst_11 {dimension_numbers = #tpu.dot_dimension_numbers<[1], [0], [0], [1], [0, 0, 1, 1], [], []>} : vector<8x4xf32>, vector<4x64xf32>, vector<8x64xf32> -> vector<8x64xf32>
    %c0_12 = arith.constant 0 : index
    %c0_13 = arith.constant 0 : index
    %13 = vector.load %arg5[%c0_12, %c0_13] : memref<1x64xf32, #tpu.memory_space<vmem>>, vector<1x64xf32>
    %14 = vector.broadcast %13 : vector<1x64xf32> to vector<8x64xf32>
    %15 = arith.addf %12, %14 : vector<8x64xf32>
    %16 = arith.negf %15 : vector<8x64xf32>
    %17 = math.exp %16 : vector<8x64xf32>
    %cst_14 = arith.constant 1.000000e+00 : f32
    %18 = vector.broadcast %cst_14 : f32 to vector<8x64xf32>
    %19 = arith.addf %18, %17 : vector<8x64xf32>
    %20 = arith.divf %18, %19 : vector<8x64xf32>
    %21 = vector.shape_cast %20 : vector<8x64xf32> to vector<8x64x1xf32>
    %22 = vector.broadcast %21 : vector<8x64x1xf32> to vector<8x64x256xf32>
    %23 = arith.mulf %0, %22 : vector<8x64x256xf32>
    %c0_15 = arith.constant 0 : index
    %c0_16 = arith.constant 0 : index
    %c0_17 = arith.constant 0 : index
    %24 = vector.load %arg6[%c0_15, %c0_16, %c0_17] : memref<8x64x256xf32, #tpu.memory_space<vmem>>, vector<8x64x256xf32>
    tpu.vector_store %arg6[%c0_15, %c0_16, %c0_17], %23 {strides = array<i32>} : memref<8x64x256xf32, #tpu.memory_space<vmem>>, vector<8x64x256xf32>,
    return
  }
  func.func @transform_0(%arg0: i32) -> (i32, i32, i32) {
    %c0_i32 = arith.constant 0 : i32
    %c0_i32_0 = arith.constant 0 : i32
    %c0_i32_1 = arith.constant 0 : i32
    return %arg0, %c0_i32, %c0_i32_0 : i32, i32, i32
  }
  func.func @transform_1(%arg0: i32) -> (i32, i32) {
    %c0_i32 = arith.constant 0 : i32
    %c0_i32_0 = arith.constant 0 : i32
    %c0_i32_1 = arith.constant 0 : i32
    return %c0_i32, %c0_i32_0 : i32, i32
  }
  func.func @transform_2(%arg0: i32) -> (i32, i32) {
    %c0_i32 = arith.constant 0 : i32
    %c0_i32_0 = arith.constant 0 : i32
    %c0_i32_1 = arith.constant 0 : i32
    return %c0_i32, %c0_i32_0 : i32, i32
  }
  func.func @transform_3(%arg0: i32) -> (i32, i32) {
    %c0_i32 = arith.constant 0 : i32
    %c0_i32_0 = arith.constant 0 : i32
    %c0_i32_1 = arith.constant 0 : i32
    return %c0_i32, %c0_i32_0 : i32, i32
  }
  func.func @transform_4(%arg0: i32) -> (i32, i32) {
    %c0_i32 = arith.constant 0 : i32
    %c0_i32_0 = arith.constant 0 : i32
    %c0_i32_1 = arith.constant 0 : i32
    return %c0_i32, %c0_i32_0 : i32, i32
  }
  func.func @transform_5(%arg0: i32) -> (i32, i32, i32) {
    %c0_i32 = arith.constant 0 : i32
    %c0_i32_0 = arith.constant 0 : i32
    %c0_i32_1 = arith.constant 0 : i32
    return %arg0, %c0_i32, %c0_i32_0 : i32, i32, i32
  }
}

</mosaic_0001>

<bundles_post_ra>
// kernel: tpu_custom_call.1
= control target key start
LH: loop header
LB: loop body
LE: loop exit
PB: predicated region body
PF: predicated region fallthrough
CT: control target
= control target key end

     0   :  { %10 = vsyncpa [#allocation3], 0  ;;  %s2040_s0 = inlined_call_operand.hbm [shape: f32[8,64,256], index: 0, kind: input, shape index: {}]   ;;  %s2041_s1 = inlined_call_operand.vmem [shape: f32[64,4], index: 1, kind: input, shape index: {}]   ;;  %s2042_s2 = inlined_call_operand.vmem [shape: f32[1,4], index: 2, kind: input, shape index: {}]   ;;  %s2043_s3 = inlined_call_operand.vmem [shape: f32[4,64], index: 3, kind: input, shape index: {}]   ;;  %s2044_s4 = inlined_call_operand.vmem [shape: f32[1,64], index: 4, kind: input, shape index: {}]   ;;  %s2045_s5 = inlined_call_operand.hbm [shape: f32[8,64,256], index: 5, kind: output, shape index: {}]  }
   0x1   :  { %11 = vsyncpa [#allocation4], 0  ;;  %s16_s20 = sshll.u32 %s2040_s0, 4  ;;  %s1649_s21 = smov [#allocation2]   ;;  %s17_s20 = int_to_ptr.hbm [resolvable:$true] %s16_s20 }
   0x2   :  { %s18_s22 = sshll.u32 %s1649_s21, 4  ;;  %s1650_s23 = smov 256   ;;  %s19_s22 = int_to_ptr.vmem [resolvable:$true] %s18_s22 }
   0x3   :  { %s1651_s24 = smov 16  }
   0x4   :  { %24 = dma.hbm_to_vmem [thread:$0]  %s17_s20, 16384, %s19_s22, [#allocation3], %s1650_s23, %s1650_s23, %s1651_s24  }
   0x5   :  { %1645 = dma.done.wait [#allocation3], 16384  }
   0x6   :  { %1646 = vsyncadd [#allocation3], 4294950912  ;;  %v41_v0 = vld [vmem:[#allocation2 + $0x20] sm:$0xff]  ;;  %v42_v1 = vld [vmem:[#allocation2 + $0x28] sm:$0xff]  ;;  %vm502_vm0 = vcmask 130112   ;;  %vm506_vm1 = vcmask 195712  }
   0x7   :  { %v37_v2 = vld [vmem:[#allocation2] sm:$0xff]  ;;  %v171_v3 = vadd.f32 %v42_v1, %v41_v0  ;;  %v38_v4 = vld [vmem:[#allocation2 + $0x8] sm:$0xff]  ;;  %v43_v9 = vld [vmem:[#allocation2 + $0x30] sm:$0xff]  ;;  %vm510_vm2 = vcmask 261312   ;;  %vm514_vm3 = vcmask 326912   ;;  %vm518_vm4 = vcmask 392512  }
   0x8   :  { %v45_v5 = vld [vmem:[#allocation2 + $0x40] sm:$0xff]  ;;  %v46_v6 = vld [vmem:[#allocation2 + $0x48] sm:$0xff]  ;;  %v165_v7 = vadd.f32 %v38_v4, %v37_v2  ;;  %v44_v10 = vld [vmem:[#allocation2 + $0x38] sm:$0xff]  ;;  %vm522_vm5 = vcmask 458112   ;;  %vm526_vm6 = vcmask 523712   ;;  %vm633_vm7 = vcmask 1041409  }
   0x9   :  { %v177_v8 = vadd.f32 %v46_v6, %v45_v5  ;;  %172 = vadd.xlane.f32.xlu1 %v171_v3  ;;  %v39_v11 = vld [vmem:[#allocation2 + $0x10] sm:$0xff]  ;;  %v40_v12 = vld [vmem:[#allocation2 + $0x18] sm:$0xff]  ;;  %v174_v15 = vadd.f32 %v44_v10, %v43_v9  ;;  %v49_v20 = vld [vmem:[#allocation2 + $0x60] sm:$0xff]  ;;  %vm635_vm8 = vcmask 1042434   ;;  %vm637_vm9 = vcmask 1043459   ;;  %s1377_s21 = sshll.u32 %s2045_s5, 4  ;;  %s1378_s21 = int_to_ptr.hbm [resolvable:$true] %s1377_s21 }
   0xa   :  { %166 = vadd.xlane.f32.xlu0 %v165_v7  ;;  %v47_v13 = vld [vmem:[#allocation2 + $0x50] sm:$0xff]  ;;  %v48_v14 = vld [vmem:[#allocation2 + $0x58] sm:$0xff]  ;;  %v168_v16 = vadd.f32 %v40_v12, %v39_v11  ;;  %v50_v21 = vld [vmem:[#allocation2 + $0x68] sm:$0xff]  ;;  %vm639_vm10 = vcmask 1044484   ;;  %vm641_vm11 = vcmask 1045509   ;;  %vm643_vm12 = vcmask 1046534  }
   0xb   :  { %178 = vadd.xlane.f32.xlu2 %v177_v8  ;;  %v180_v17 = vadd.f32 %v48_v14, %v47_v13  ;;  %v51_v18 = vld [vmem:[#allocation2 + $0x70] sm:$0xff]  ;;  %v52_v19 = vld [vmem:[#allocation2 + $0x78] sm:$0xff]  ;;  %v53_v22 = vld [vmem:[#allocation2 + $0x80] sm:$0xff]  ;;  %v183_v25 = vadd.f32 %v50_v21, %v49_v20  ;;  %vm645_vm13 = vcmask 1047559   ;;  %vm647_vm14 = vcmask 523264  }
   0xc   :  { %v54_v23 = vld [vmem:[#allocation2 + $0x88] sm:$0xff]  ;;  %v186_v24 = vadd.f32 %v52_v19, %v51_v18  ;;  %v57_v27 = vld [vmem:[#allocation2 + $0xa0] sm:$0xff]  ;;  %v55_v29 = vld [vmem:[#allocation2 + $0x90] sm:$0xff]  ;;  %vm680_vm15 = vcmask 1043456  }
   0xd   :  { %v189_v26 = vadd.f32 %v54_v23, %v53_v22  ;;  %v58_v28 = vld [vmem:[#allocation2 + $0xa8] sm:$0xff]  ;;  %v56_v30 = vld [vmem:[#allocation2 + $0x98] sm:$0xff]  ;;  %v59_v31 = vld [vmem:[#allocation2 + $0xb0] sm:$0xff] }
   0xe   :  { %v60_v32 = vld [vmem:[#allocation2 + $0xb8] sm:$0xff]  ;;  %v195_v33 = vadd.f32 %v58_v28, %v57_v27  ;;  %v192_v34 = vadd.f32 %v56_v30, %v55_v29  ;;  %v63_v36 = vld [vmem:[#allocation2 + $0xd0] sm:$0xff]  ;;  %v61_v38 = vld [vmem:[#allocation2 + $0xc0] sm:$0xff] }
   0xf   :  { %v198_v35 = vadd.f32 %v60_v32, %v59_v31  ;;  %v64_v37 = vld [vmem:[#allocation2 + $0xd8] sm:$0xff]  ;;  %v62_v39 = vld [vmem:[#allocation2 + $0xc8] sm:$0xff]  ;;  %v65_v40 = vld [vmem:[#allocation2 + $0xe0] sm:$0xff] }
  0x10   :  { %v66_v41 = vld [vmem:[#allocation2 + $0xe8] sm:$0xff]  ;;  %v204_v42 = vadd.f32 %v64_v37, %v63_v36  ;;  %v201_v43 = vadd.f32 %v62_v39, %v61_v38  ;;  %v69_v45 = vld [vmem:[#allocation2 + $0x100] sm:$0xff]  ;;  %v67_v47 = vld [vmem:[#allocation2 + $0xf0] sm:$0xff] }
  0x11   :  { %175 = vadd.xlane.f32.xlu1 %v174_v15  ;;  %v207_v44 = vadd.f32 %v66_v41, %v65_v40  ;;  %v70_v46 = vld [vmem:[#allocation2 + $0x108] sm:$0xff]  ;;  %v68_v48 = vld [vmem:[#allocation2 + $0xf8] sm:$0xff]  ;;  %v71_v49 = vld [vmem:[#allocation2 + $0x110] sm:$0xff] }
  0x12   :  { %169 = vadd.xlane.f32.xlu0 %v168_v16  ;;  %v72_v50 = vld [vmem:[#allocation2 + $0x118] sm:$0xff]  ;;  %v213_v51 = vadd.f32 %v70_v46, %v69_v45  ;;  %v210_v52 = vadd.f32 %v68_v48, %v67_v47  ;;  %v75_v54 = vld [vmem:[#allocation2 + $0x130] sm:$0xff]  ;;  %v73_v56 = vld [vmem:[#allocation2 + $0x120] sm:$0xff] }
  0x13   :  { %181 = vadd.xlane.f32.xlu2 %v180_v17  ;;  %v216_v53 = vadd.f32 %v72_v50, %v71_v49  ;;  %v76_v55 = vld [vmem:[#allocation2 + $0x138] sm:$0xff]  ;;  %v74_v57 = vld [vmem:[#allocation2 + $0x128] sm:$0xff]  ;;  %v77_v58 = vld [vmem:[#allocation2 + $0x140] sm:$0xff] }
  0x14   :  { %v78_v59 = vld [vmem:[#allocation2 + $0x148] sm:$0xff]  ;;  %v222_v60 = vadd.f32 %v76_v55, %v75_v54  ;;  %v219_v61 = vadd.f32 %v74_v57, %v73_v56  ;;  %v81_v63 = vld [vmem:[#allocation2 + $0x160] sm:$0xff]  ;;  %v79_v1 = vld [vmem:[#allocation2 + $0x150] sm:$0xff] }
  0x15   :  { %v225_v62 = vadd.f32 %v78_v59, %v77_v58  ;;  %v82_v0 = vld [vmem:[#allocation2 + $0x168] sm:$0xff]  ;;  %v80_v2 = vld [vmem:[#allocation2 + $0x158] sm:$0xff]  ;;  %v83_v3 = vld [vmem:[#allocation2 + $0x170] sm:$0xff] }
  0x16   :  { %v84_v4 = vld [vmem:[#allocation2 + $0x178] sm:$0xff]  ;;  %v231_v5 = vadd.f32 %v82_v0, %v81_v63  ;;  %v228_v6 = vadd.f32 %v80_v2, %v79_v1  ;;  %v87_v8 = vld [vmem:[#allocation2 + $0x190] sm:$0xff]  ;;  %v85_v10 = vld [vmem:[#allocation2 + $0x180] sm:$0xff] }
  0x17   :  { %v234_v7 = vadd.f32 %v84_v4, %v83_v3  ;;  %v88_v9 = vld [vmem:[#allocation2 + $0x198] sm:$0xff]  ;;  %v86_v11 = vld [vmem:[#allocation2 + $0x188] sm:$0xff]  ;;  %v89_v12 = vld [vmem:[#allocation2 + $0x1a0] sm:$0xff] }
  0x18   :  { %v90_v13 = vld [vmem:[#allocation2 + $0x1a8] sm:$0xff]  ;;  %v240_v14 = vadd.f32 %v88_v9, %v87_v8  ;;  %v237_v15 = vadd.f32 %v86_v11, %v85_v10  ;;  %v93_v17 = vld [vmem:[#allocation2 + $0x1c0] sm:$0xff]  ;;  %v91_v19 = vld [vmem:[#allocation2 + $0x1b0] sm:$0xff] }
  0x19   :  { %187 = vadd.xlane.f32.xlu1 %v186_v24  ;;  %v243_v16 = vadd.f32 %v90_v13, %v89_v12  ;;  %v94_v18 = vld [vmem:[#allocation2 + $0x1c8] sm:$0xff]  ;;  %v92_v20 = vld [vmem:[#allocation2 + $0x1b8] sm:$0xff]  ;;  %v95_v21 = vld [vmem:[#allocation2 + $0x1d0] sm:$0xff] }
  0x1a   :  { %184 = vadd.xlane.f32.xlu0 %v183_v25  ;;  %v96_v22 = vld [vmem:[#allocation2 + $0x1d8] sm:$0xff]  ;;  %v249_v23 = vadd.f32 %v94_v18, %v93_v17  ;;  %v246_v24 = vadd.f32 %v92_v20, %v91_v19  ;;  %v97_v28 = vld [vmem:[#allocation2 + $0x1e0] sm:$0xff]  ;;  %v98_v29 = vld [vmem:[#allocation2 + $0x1e8] sm:$0xff]  ;;  %v497_v17 = vlaneseq }
  0x1b   :  { %190 = vadd.xlane.f32.xlu2 %v189_v26  ;;  %v252_v25 = vadd.f32 %v96_v22, %v95_v21  ;;  %v99_v26 = vld [vmem:[#allocation2 + $0x1f0] sm:$0xff]  ;;  %v100_v27 = vld [vmem:[#allocation2 + $0x1f8] sm:$0xff]  ;;  %v101_v30 = vld [vmem:[#allocation2 + $0x200] sm:$0xff] }
  0x1c   :  { %v102_v31 = vld [vmem:[#allocation2 + $0x208] sm:$0xff]  ;;  %v258_v32 = vadd.f32 %v100_v27, %v99_v26  ;;  %v103_v37 = vld [vmem:[#allocation2 + $0x210] sm:$0xff]  ;;  %v104_v38 = vld [vmem:[#allocation2 + $0x218] sm:$0xff]  ;;  %v1690_v21 = vand.u32 127, %v497_v17 }
  0x1d   :  { %v106_v36 = vld [vmem:[#allocation2 + $0x228] sm:$0xff]  ;;  %v107_v39 = vld [vmem:[#allocation2 + $0x230] sm:$0xff]  ;;  %v108_v40 = vld [vmem:[#allocation2 + $0x238] sm:$0xff] }
  0x1e   :  { %v112_v45 = vld [vmem:[#allocation2 + $0x258] sm:$0xff]  ;;  %v109_v46 = vld [vmem:[#allocation2 + $0x240] sm:$0xff]  ;;  %v110_v47 = vld [vmem:[#allocation2 + $0x248] sm:$0xff]  ;;  %v1693_v27 = vadd.s32 4294967280, %v1690_v21 }
  0x1f   :  { %v113_v48 = vld [vmem:[#allocation2 + $0x260] sm:$0xff]  ;;  %v114_v49 = vld [vmem:[#allocation2 + $0x268] sm:$0xff]  ;;  %v115_v55 = vld [vmem:[#allocation2 + $0x270] sm:$0xff] }
  0x20   :  { %v118_v54 = vld [vmem:[#allocation2 + $0x288] sm:$0xff]  ;;  %v116_v56 = vld [vmem:[#allocation2 + $0x278] sm:$0xff]  ;;  %v119_v57 = vld [vmem:[#allocation2 + $0x290] sm:$0xff] }
  0x21   :  { %196 = vadd.xlane.f32.xlu1 %v195_v33  ;;  %v255_v33 = vadd.f32 %v98_v29, %v97_v28  ;;  %v120_v58 = vld [vmem:[#allocation2 + $0x298] sm:$0xff]  ;;  %v121_v0 = vld [vmem:[#allocation2 + $0x2a0] sm:$0xff]  ;;  %v122_v1 = vld [vmem:[#allocation2 + $0x2a8] sm:$0xff]  ;;  %v1696_v29 = vadd.s32 4294967272, %v1690_v21 }
  0x22   :  { %193 = vadd.xlane.f32.xlu0 %v192_v34  ;;  %v261_v34 = vadd.f32 %v102_v31, %v101_v30  ;;  %v124_v63 = vld [vmem:[#allocation2 + $0x2b8] sm:$0xff]  ;;  %v125_v2 = vld [vmem:[#allocation2 + $0x2c0] sm:$0xff]  ;;  %v126_v3 = vld [vmem:[#allocation2 + $0x2c8] sm:$0xff]  ;;  %v1699_v31 = vadd.s32 4294967288, %v1690_v21 }
  0x23   :  { %199 = vadd.xlane.f32.xlu2 %v198_v35  ;;  %v105_v35 = vld [vmem:[#allocation2 + $0x220] sm:$0xff]  ;;  %v130_v8 = vld [vmem:[#allocation2 + $0x2e8] sm:$0xff]  ;;  %v127_v9 = vld [vmem:[#allocation2 + $0x2d0] sm:$0xff] }
  0x24   :  { %v267_v41 = vadd.f32 %v106_v36, %v105_v35  ;;  %v128_v10 = vld [vmem:[#allocation2 + $0x2d8] sm:$0xff]  ;;  %v131_v11 = vld [vmem:[#allocation2 + $0x2f0] sm:$0xff]  ;;  %v138_v26 = vld [vmem:[#allocation2 + $0x328] sm:$0xff] }
  0x25   :  { %v132_v12 = vld [vmem:[#allocation2 + $0x2f8] sm:$0xff]  ;;  %v300_v18 = vadd.f32 %v128_v10, %v127_v9  ;;  %v135_v20 = vld [vmem:[#allocation2 + $0x310] sm:$0xff]  ;;  %v145_v9 = vld [vmem:[#allocation2 + $0x360] sm:$0xff] }
  0x26   :  { %v306_v19 = vadd.f32 %v132_v12, %v131_v11  ;;  %v136_v22 = vld [vmem:[#allocation2 + $0x318] sm:$0xff]  ;;  %v146_v12 = vld [vmem:[#allocation2 + $0x368] sm:$0xff] }
  0x27   :  { %v312_v36 = vadd.f32 %v136_v22, %v135_v20 }
  0x29   :  { %205 = vadd.xlane.f32.xlu1 %v204_v42  ;;  %v264_v42 = vadd.f32 %v104_v38, %v103_v37 }
  0x2a   :  { %202 = vadd.xlane.f32.xlu0 %v201_v43  ;;  %v270_v43 = vadd.f32 %v108_v40, %v107_v39  ;;  %v1702_v39 = vadd.s32 4294967256, %v1690_v21 }
  0x2b   :  { %208 = vadd.xlane.f32.xlu2 %v207_v44  ;;  %v111_v44 = vld [vmem:[#allocation2 + $0x250] sm:$0xff] }
  0x2c   :  { %v276_v50 = vadd.f32 %v112_v45, %v111_v44 }
  0x31   :  { %214 = vadd.xlane.f32.xlu1 %v213_v51  ;;  %v273_v51 = vadd.f32 %v110_v47, %v109_v46 }
  0x32   :  { %211 = vadd.xlane.f32.xlu0 %v210_v52  ;;  %v279_v52 = vadd.f32 %v114_v49, %v113_v48 }
  0x33   :  { %217 = vadd.xlane.f32.xlu2 %v216_v53  ;;  %v117_v53 = vld [vmem:[#allocation2 + $0x280] sm:$0xff] }
  0x34   :  { %v285_v59 = vadd.f32 %v118_v54, %v117_v53 }
  0x39   :  { %223 = vadd.xlane.f32.xlu1 %v222_v60  ;;  %v282_v60 = vadd.f32 %v116_v56, %v115_v55  ;;  %v1716_v55 = vadd.s32 4294967240, %v1690_v21  ;;  %v140_v56 = vld [vmem:[#allocation2 + $0x338] sm:$0xff] }
  0x3a   :  { %220 = vadd.xlane.f32.xlu0 %v219_v61  ;;  %v288_v61 = vadd.f32 %v120_v58, %v119_v57  ;;  %v143_v57 = vld [vmem:[#allocation2 + $0x350] sm:$0xff]  ;;  %v144_v58 = vld [vmem:[#allocation2 + $0x358] sm:$0xff] }
  0x3b   :  { %226 = vadd.xlane.f32.xlu2 %v225_v62  ;;  %v123_v62 = vld [vmem:[#allocation2 + $0x2b0] sm:$0xff] }
  0x3c   :  { %v294_v4 = vadd.f32 %v124_v63, %v123_v62 }
  0x41   :  { %232 = vadd.xlane.f32.xlu1 %v231_v5  ;;  %v291_v5 = vadd.f32 %v122_v1, %v121_v0 }
  0x42   :  { %229 = vadd.xlane.f32.xlu0 %v228_v6  ;;  %v297_v6 = vadd.f32 %v126_v3, %v125_v2 }
  0x43   :  { %235 = vadd.xlane.f32.xlu2 %v234_v7  ;;  %v129_v7 = vld [vmem:[#allocation2 + $0x2e0] sm:$0xff] }
  0x49   :  { %241 = vadd.xlane.f32.xlu1 %v240_v14 }
  0x4a   :  { %238 = vadd.xlane.f32.xlu0 %v237_v15 }
  0x4b   :  { %244 = vadd.xlane.f32.xlu2 %v243_v16  ;;  %v303_v16 = vadd.f32 %v130_v8, %v129_v7 }
  0x51   :  { %250 = vadd.xlane.f32.xlu1 %v249_v23  ;;  %v133_v23 = vld [vmem:[#allocation2 + $0x300] sm:$0xff] }
  0x52   :  { %247 = vadd.xlane.f32.xlu0 %v246_v24  ;;  %v134_v24 = vld [vmem:[#allocation2 + $0x308] sm:$0xff] }
  0x53   :  { %253 = vadd.xlane.f32.xlu2 %v252_v25  ;;  %v137_v25 = vld [vmem:[#allocation2 + $0x320] sm:$0xff]  ;;  %v309_v37 = vadd.f32 %v134_v24, %v133_v23  ;;  %v327_v24 = vadd.f32 %v146_v12, %v145_v9 }
  0x59   :  { %259 = vadd.xlane.f32.xlu1 %v258_v32 }
  0x5a   :  { %256 = vadd.xlane.f32.xlu0 %v255_v33 }
  0x5b   :  { %262 = vadd.xlane.f32.xlu2 %v261_v34 }
  0x61   :  { %268 = vadd.xlane.f32.xlu1 %v267_v41  ;;  %v315_v41 = vadd.f32 %v138_v26, %v137_v25 }
  0x62   :  { %265 = vadd.xlane.f32.xlu0 %v264_v42  ;;  %v1705_v42 = vadd.s32 4294967264, %v1690_v21 }
  0x63   :  { %271 = vadd.xlane.f32.xlu2 %v270_v43 }
  0x69   :  { %277 = vadd.xlane.f32.xlu1 %v276_v50  ;;  %v139_v50 = vld [vmem:[#allocation2 + $0x330] sm:$0xff] }
  0x6a   :  { %274 = vadd.xlane.f32.xlu0 %v273_v51  ;;  %v141_v51 = vld [vmem:[#allocation2 + $0x340] sm:$0xff] }
  0x6b   :  { %280 = vadd.xlane.f32.xlu2 %v279_v52  ;;  %v142_v52 = vld [vmem:[#allocation2 + $0x348] sm:$0xff] }
  0x6c   :  { %v321_v2 = vadd.f32 %v142_v52, %v141_v51 }
  0x71   :  { %286 = vadd.xlane.f32.xlu1 %v285_v59 }
  0x72   :  { %283 = vadd.xlane.f32.xlu0 %v282_v60 }
  0x73   :  { %289 = vadd.xlane.f32.xlu2 %v288_v61  ;;  %v1720_v61 = vadd.s32 4294967248, %v1690_v21 }
  0x79   :  { %295 = vadd.xlane.f32.xlu1 %v294_v4 }
  0x7a   :  { %292 = vadd.xlane.f32.xlu0 %v291_v5  ;;  %v318_v5 = vadd.f32 %v140_v56, %v139_v50 }
  0x7b   :  { %298 = vadd.xlane.f32.xlu2 %v297_v6  ;;  %v324_v6 = vadd.f32 %v144_v58, %v143_v57 }
  0x7c   :  { %v173_v13 = vpop.xlane.xlu1 %172 }
  0x7d   :  { %v167_v14 = vpop.xlane.xlu0 %166  ;;  %v359_v32 = vmul.f32 0.005, %v173_v13  ;;  %v147_v13 = vld [vmem:[#allocation2 + $0x370] sm:$0xff] }
  0x7e   :  { %v179_v15 = vpop.xlane.xlu2 %178  ;;  %v357_v28 = vmul.f32 0.005, %v167_v14  ;;  %v148_v14 = vld [vmem:[#allocation2 + $0x378] sm:$0xff] }
  0x7f   :  { %v361_v43 = vmul.f32 0.005, %v179_v15  ;;  %v505_v47 = vperm.slane %v359_v32, %v1693_v27  ;;  %v330_v25 = vadd.f32 %v148_v14, %v147_v13 }
  0x80   :  { %v499_v44 = vperm.slane %v357_v28, %v1690_v21 }
  0x81   :  { %304 = vadd.xlane.f32.xlu1 %v303_v16  ;;  %v513_v53 = vperm.slane %v361_v43, %v1705_v42  ;;  %v149_v16 = vld [vmem:[#allocation2 + $0x380] sm:$0xff]  ;;  %v152_v43 = vld [vmem:[#allocation2 + $0x398] sm:$0xff] }
  0x82   :  { %301 = vadd.xlane.f32.xlu0 %v300_v18  ;;  %v150_v18 = vld [vmem:[#allocation2 + $0x388] sm:$0xff] }
  0x83   :  { %307 = vadd.xlane.f32.xlu2 %v306_v19  ;;  %v333_v32 = vadd.f32 %v150_v18, %v149_v16 }
  0x84   :  { %v176_v30 = vpop.xlane.xlu1 %175 }
  0x85   :  { %v360_v33 = vmul.f32 0.005, %v176_v30  ;;  %v170_v34 = vpop.xlane.xlu0 %169 }
  0x86   :  { %v182_v35 = vpop.xlane.xlu2 %181  ;;  %v358_v38 = vmul.f32 0.005, %v170_v34 }
  0x87   :  { %v362_v40 = vmul.f32 0.005, %v182_v35  ;;  %v509_v45 = vperm.slane %v360_v33, %v1696_v29 }
  0x88   :  { %v501_v46 = vperm.slane %v358_v38, %v1699_v31  ;;  %v153_v38 = vld [vmem:[#allocation2 + $0x3a0] sm:$0xff] }
  0x89   :  { %313 = vadd.xlane.f32.xlu1 %v312_v36  ;;  %v517_v49 = vperm.slane %v362_v40, %v1702_v39  ;;  %v154_v40 = vld [vmem:[#allocation2 + $0x3a8] sm:$0xff] }
  0x8a   :  { %v503_v48 = vsel %vm502_vm0, %v501_v46, %v499_v44  ;;  %310 = vadd.xlane.f32.xlu0 %v309_v37  ;;  %v151_v37 = vld [vmem:[#allocation2 + $0x390] sm:$0xff]  ;;  %v339_v51 = vadd.f32 %v154_v40, %v153_v38 }
  0x8b   :  { %316 = vadd.xlane.f32.xlu2 %v315_v41  ;;  %v507_v54 = vsel %vm506_vm1, %v505_v47, %v503_v48  ;;  %v155_v44 = vld [vmem:[#allocation2 + $0x3b0] sm:$0xff] }
  0x8c   :  { %v511_v59 = vsel %vm510_vm2, %v509_v45, %v507_v54  ;;  %v188_v60 = vpop.xlane.xlu1 %187  ;;  %v156_v45 = vld [vmem:[#allocation2 + $0x3b8] sm:$0xff]  ;;  %v336_v54 = vadd.f32 %v152_v43, %v151_v37 }
  0x8d   :  { %v515_v62 = vsel %vm514_vm3, %v513_v53, %v511_v59  ;;  %v364_v63 = vmul.f32 0.005, %v188_v60  ;;  %v185_v0 = vpop.xlane.xlu0 %184  ;;  %v342_v56 = vadd.f32 %v156_v45, %v155_v44 }
  0x8e   :  { %v191_v1 = vpop.xlane.xlu2 %190  ;;  %v519_v3 = vsel %vm518_vm4, %v517_v49, %v515_v62  ;;  %v363_v4 = vmul.f32 0.005, %v185_v0  ;;  %v157_v62 = vld [vmem:[#allocation2 + $0x3c0] sm:$0xff]  ;;  %v160_v0 = vld [vmem:[#allocation2 + $0x3d8] sm:$0xff] }
  0x8f   :  { %v525_v7 = vperm.slane %v364_v63, %v1716_v55  ;;  %v365_v11 = vmul.f32 0.005, %v191_v1  ;;  %v159_v63 = vld [vmem:[#allocation2 + $0x3d0] sm:$0xff] }
  0x90   :  { %v521_v8 = vperm.slane %v363_v4, %v1720_v61  ;;  %v162_v4 = vld [vmem:[#allocation2 + $0x3e8] sm:$0xff] }
  0x91   :  { %322 = vadd.xlane.f32.xlu1 %v321_v2  ;;  %v528_v26 = vperm.slane %v365_v11, %v1690_v21  ;;  %v158_v2 = vld [vmem:[#allocation2 + $0x3c8] sm:$0xff] }
  0x92   :  { %v523_v10 = vsel %vm522_vm5, %v521_v8, %v519_v3  ;;  %319 = vadd.xlane.f32.xlu0 %v318_v5  ;;  %v161_v3 = vld [vmem:[#allocation2 + $0x3e0] sm:$0xff]  ;;  %v345_v13 = vadd.f32 %v158_v2, %v157_v62 }
  0x93   :  { %325 = vadd.xlane.f32.xlu2 %v324_v6  ;;  %v1728_v15 = vsel %vm526_vm6, %v525_v7, %v523_v10  ;;  %v348_v10 = vadd.f32 %v160_v0, %v159_v63  ;;  %v351_v14 = vadd.f32 %v162_v4, %v161_v3 }
  0x94   :  { %v197_v19 = vpop.xlane.xlu1 %196 }
  0x95   :  { %v367_v20 = vmul.f32 0.005, %v197_v19  ;;  %v194_v22 = vpop.xlane.xlu0 %193 }
  0x96   :  { %v200_v23 = vpop.xlane.xlu2 %199  ;;  %v366_v28 = vmul.f32 0.005, %v194_v22 }
  0x97   :  { %v368_v30 = vmul.f32 0.005, %v200_v23  ;;  %v531_v33 = vperm.slane %v367_v20, %v1693_v27 }
  0x98   :  { %v529_v34 = vperm.slane %v366_v28, %v1699_v31 }
  0x99   :  { %v533_v35 = vperm.slane %v368_v30, %v1696_v29  ;;  %331 = vadd.xlane.f32.xlu1 %v330_v25  ;;  %v164_v25 = vld [vmem:[#allocation2 + $0x3f8] sm:$0xff] }
  0x9a   :  { %v530_v36 = vsel %vm502_vm0, %v529_v34, %v528_v26  ;;  %328 = vadd.xlane.f32.xlu0 %v327_v24  ;;  %v163_v24 = vld [vmem:[#allocation2 + $0x3f0] sm:$0xff] }
  0x9b   :  { %334 = vadd.xlane.f32.xlu2 %v333_v32  ;;  %v532_v41 = vsel %vm506_vm1, %v531_v33, %v530_v36 }
  0x9c   :  { %v534_v46 = vsel %vm510_vm2, %v533_v35, %v532_v41  ;;  %v206_v47 = vpop.xlane.xlu1 %205  ;;  %v354_v35 = vadd.f32 %v164_v25, %v163_v24 }
  0x9d   :  { %v370_v48 = vmul.f32 0.005, %v206_v47  ;;  %v203_v49 = vpop.xlane.xlu0 %202 }
  0x9e   :  { %v209_v50 = vpop.xlane.xlu2 %208  ;;  %v369_v52 = vmul.f32 0.005, %v203_v49 }
  0x9f   :  { %v371_v53 = vmul.f32 0.005, %v209_v50  ;;  %v537_v57 = vperm.slane %v370_v48, %v1702_v39 }
  0xa0   :  { %v535_v58 = vperm.slane %v369_v52, %v1705_v42 }
  0xa1   :  { %v539_v59 = vperm.slane %v371_v53, %v1720_v61  ;;  %340 = vadd.xlane.f32.xlu1 %v339_v51 }
  0xa2   :  { %v536_v60 = vsel %vm514_vm3, %v535_v58, %v534_v46  ;;  %337 = vadd.xlane.f32.xlu0 %v336_v54 }
  0xa3   :  { %343 = vadd.xlane.f32.xlu2 %v342_v56  ;;  %v538_v1 = vsel %vm518_vm4, %v537_v57, %v536_v60 }
  0xa4   :  { %v540_v5 = vsel %vm522_vm5, %v539_v59, %v538_v1  ;;  %v215_v6 = vpop.xlane.xlu1 %214 }
  0xa5   :  { %v373_v7 = vmul.f32 0.005, %v215_v6  ;;  %v212_v8 = vpop.xlane.xlu0 %211 }
  0xa6   :  { %v218_v9 = vpop.xlane.xlu2 %217  ;;  %v372_v11 = vmul.f32 0.005, %v212_v8 }
  0xa7   :  { %v374_v12 = vmul.f32 0.005, %v218_v9  ;;  %v543_v16 = vperm.slane %v373_v7, %v1690_v21 }
  0xa8   :  { %v541_v18 = vperm.slane %v372_v11, %v1716_v55 }
  0xa9   :  { %v544_v19 = vperm.slane %v374_v12, %v1699_v31  ;;  %349 = vadd.xlane.f32.xlu1 %v348_v10 }
  0xaa   :  { %v542_v20 = vsel %vm526_vm6, %v541_v18, %v540_v5  ;;  %346 = vadd.xlane.f32.xlu0 %v345_v13 }
  0xab   :  { %v545_v22 = vsel %vm502_vm0, %v544_v19, %v543_v16  ;;  %352 = vadd.xlane.f32.xlu2 %v351_v14  ;;  %v634_v23 = vsel %vm633_vm7, %v542_v20, %v1728_v15 }
  0xac   :  { %v224_v26 = vpop.xlane.xlu1 %223 }
  0xad   :  { %v376_v28 = vmul.f32 0.005, %v224_v26  ;;  %v221_v30 = vpop.xlane.xlu0 %220 }
  0xae   :  { %v227_v32 = vpop.xlane.xlu2 %226  ;;  %v375_v33 = vmul.f32 0.005, %v221_v30 }
  0xaf   :  { %v377_v34 = vmul.f32 0.005, %v227_v32  ;;  %v548_v36 = vperm.slane %v376_v28, %v1696_v29 }
  0xb0   :  { %v546_v37 = vperm.slane %v375_v33, %v1693_v27 }
  0xb1   :  { %v550_v38 = vperm.slane %v377_v34, %v1705_v42 }
  0xb2   :  { %v547_v40 = vsel %vm506_vm1, %v546_v37, %v545_v22  ;;  %355 = vadd.xlane.f32.xlu0 %v354_v35 }
  0xb3   :  { %v549_v15 = vsel %vm510_vm2, %v548_v36, %v547_v40 }
  0xb4   :  { %v551_v41 = vsel %vm514_vm3, %v550_v38, %v549_v15  ;;  %v233_v43 = vpop.xlane.xlu1 %232 }
  0xb5   :  { %v379_v44 = vmul.f32 0.005, %v233_v43  ;;  %v230_v45 = vpop.xlane.xlu0 %229 }
  0xb6   :  { %v236_v46 = vpop.xlane.xlu2 %235  ;;  %v378_v47 = vmul.f32 0.005, %v230_v45 }
  0xb7   :  { %v380_v48 = vmul.f32 0.005, %v236_v46  ;;  %v554_v49 = vperm.slane %v379_v44, %v1720_v61 }
  0xb8   :  { %v552_v50 = vperm.slane %v378_v47, %v1702_v39 }
  0xb9   :  { %v556_v51 = vperm.slane %v380_v48, %v1716_v55 }
  0xba   :  { %v553_v52 = vsel %vm518_vm4, %v552_v50, %v551_v41 }
  0xbb   :  { %v555_v53 = vsel %vm522_vm5, %v554_v49, %v553_v52 }
  0xbc   :  { %v557_v54 = vsel %vm526_vm6, %v556_v51, %v555_v53  ;;  %v242_v56 = vpop.xlane.xlu1 %241 }
  0xbd   :  { %v636_v57 = vsel %vm635_vm8, %v557_v54, %v634_v23  ;;  %v382_v58 = vmul.f32 0.005, %v242_v56  ;;  %v239_v59 = vpop.xlane.xlu0 %238 }
  0xbe   :  { %v245_v60 = vpop.xlane.xlu2 %244  ;;  %v381_v62 = vmul.f32 0.005, %v239_v59 }
  0xbf   :  { %v383_v63 = vmul.f32 0.005, %v245_v60  ;;  %v559_v0 = vperm.slane %v382_v58, %v1699_v31 }
  0xc0   :  { %v558_v1 = vperm.slane %v381_v62, %v1690_v21 }
  0xc1   :  { %v561_v2 = vperm.slane %v383_v63, %v1693_v27 }
  0xc2   :  { %v560_v3 = vsel %vm502_vm0, %v559_v0, %v558_v1 }
  0xc3   :  { %v562_v4 = vsel %vm506_vm1, %v561_v2, %v560_v3 }
  0xc4   :  { %v251_v5 = vpop.xlane.xlu1 %250 }
  0xc5   :  { %v385_v6 = vmul.f32 0.005, %v251_v5  ;;  %v248_v7 = vpop.xlane.xlu0 %247 }
  0xc6   :  { %v254_v8 = vpop.xlane.xlu2 %253  ;;  %v384_v9 = vmul.f32 0.005, %v248_v7 }
  0xc7   :  { %v386_v10 = vmul.f32 0.005, %v254_v8  ;;  %v565_v11 = vperm.slane %v385_v6, %v1705_v42 }
  0xc8   :  { %v563_v12 = vperm.slane %v384_v9, %v1696_v29 }
  0xc9   :  { %v567_v13 = vperm.slane %v386_v10, %v1702_v39 }
  0xca   :  { %v564_v14 = vsel %vm510_vm2, %v563_v12, %v562_v4  ;;  %v428_v12 = vld [vmem:[%s2041_s1 + $0x38] sm:$0xff] }
  0xcb   :  { %v566_v16 = vsel %vm514_vm3, %v565_v11, %v564_v14  ;;  %658 = vmatpush.msra.mxu0 %v428_v12 }
  0xcc   :  { %v568_v18 = vsel %vm518_vm4, %v567_v13, %v566_v16  ;;  %v260_v19 = vpop.xlane.xlu1 %259  ;;  %v427_v16 = vld [vmem:[%s2041_s1 + $0x30] sm:$0xff] }
  0xcd   :  { %v388_v20 = vmul.f32 0.005, %v260_v19  ;;  %v257_v22 = vpop.xlane.xlu0 %256  ;;  %659 = vmatpush.msra.mxu0 %v427_v16  ;;  %v425_v19 = vld [vmem:[%s2041_s1 + $0x20] sm:$0xff] }
  0xce   :  { %v263_v23 = vpop.xlane.xlu2 %262  ;;  %v387_v24 = vmul.f32 0.005, %v257_v22 }
  0xcf   :  { %v571_v25 = vperm.slane %v388_v20, %v1716_v55  ;;  %v389_v30 = vmul.f32 0.005, %v263_v23  ;;  %v424_v20 = vld [vmem:[%s2041_s1 + $0x18] sm:$0xff] }
  0xd0   :  { %v569_v26 = vperm.slane %v387_v24, %v1720_v61 }
  0xd1   :  { %v573_v38 = vperm.slane %v389_v30, %v1690_v21 }
  0xd2   :  { %v570_v28 = vsel %vm522_vm5, %v569_v26, %v568_v18  ;;  %v426_v18 = vld [vmem:[%s2041_s1 + $0x28] sm:$0xff] }
  0xd3   :  { %v572_v32 = vsel %vm526_vm6, %v571_v25, %v570_v28  ;;  %660 = vmatpush.msra.mxu0 %v426_v18  ;;  %v423_v25 = vld [vmem:[%s2041_s1 + $0x10] sm:$0xff]  ;;  %v422_v26 = vld [vmem:[%s2041_s1 + $0x8] sm:$0xff]  ;;  %v421_v28 = vld [vmem:[%s2041_s1] sm:$0xff] }
  0xd4   :  { %v269_v33 = vpop.xlane.xlu1 %268  ;;  %v638_v34 = vsel %vm637_vm9, %v572_v32, %v636_v57 }
  0xd5   :  { %v391_v35 = vmul.f32 0.005, %v269_v33  ;;  %v266_v36 = vpop.xlane.xlu0 %265  ;;  %661 = vmatpush.msra.mxu0 %v425_v19 }
  0xd6   :  { %v272_v37 = vpop.xlane.xlu2 %271  ;;  %v390_v40 = vmul.f32 0.005, %v266_v36 }
  0xd7   :  { %v392_v15 = vmul.f32 0.005, %v272_v37  ;;  %v576_v41 = vperm.slane %v391_v35, %v1693_v27  ;;  %662 = vmatpush.msra.mxu0 %v424_v20 }
  0xd8   :  { %v574_v43 = vperm.slane %v390_v40, %v1699_v31 }
  0xd9   :  { %v578_v44 = vperm.slane %v392_v15, %v1696_v29  ;;  %663 = vmatpush.msra.mxu0 %v423_v25 }
  0xda   :  { %v575_v45 = vsel %vm502_vm0, %v574_v43, %v573_v38 }
  0xdb   :  { %v577_v46 = vsel %vm506_vm1, %v576_v41, %v575_v45  ;;  %664 = vmatpush.msra.mxu0 %v422_v26 }
  0xdc   :  { %v579_v47 = vsel %vm510_vm2, %v578_v44, %v577_v46  ;;  %v278_v48 = vpop.xlane.xlu1 %277 }
  0xdd   :  { %v275_v49 = vpop.xlane.xlu0 %274  ;;  %v394_v51 = vmul.f32 0.005, %v278_v48  ;;  %665 = vmatpush.msra.mxu0 %v421_v28 }
  0xde   :  { %v281_v50 = vpop.xlane.xlu2 %280  ;;  %v393_v52 = vmul.f32 0.005, %v275_v49 }
  0xdf   :  { %v395_v54 = vmul.f32 0.005, %v281_v50  ;;  %v582_v56 = vperm.slane %v394_v51, %v1702_v39 }
  0xe0   :  { %v580_v53 = vperm.slane %v393_v52, %v1705_v42 }
  0xe1   :  { %v584_v59 = vperm.slane %v395_v54, %v1720_v61 }
  0xe2   :  { %v581_v57 = vsel %vm514_vm3, %v580_v53, %v579_v47 }
  0xe3   :  { %v583_v63 = vsel %vm518_vm4, %v582_v56, %v581_v57 }
  0xe4   :  { %v287_v58 = vpop.xlane.xlu1 %286  ;;  %v585_v2 = vsel %vm522_vm5, %v584_v59, %v583_v63 }
  0xe5   :  { %v284_v60 = vpop.xlane.xlu0 %283  ;;  %v397_v30 = vmul.f32 0.005, %v287_v58 }
  0xe6   :  { %v290_v62 = vpop.xlane.xlu2 %289  ;;  %v396_v0 = vmul.f32 0.005, %v284_v60 }
  0xe7   :  { %v398_v32 = vmul.f32 0.005, %v290_v62  ;;  %v588_v37 = vperm.slane %v397_v30, %v1690_v21 }
  0xe8   :  { %v586_v1 = vperm.slane %v396_v0, %v1716_v55 }
  0xe9   :  { %v589_v38 = vperm.slane %v398_v32, %v1699_v31 }
  0xea   :  { %v587_v3 = vsel %vm526_vm6, %v586_v1, %v585_v2 }
  0xeb   :  { %v1791_v4 = vsel %vm639_vm10, %v587_v3, %v638_v34  ;;  %v590_v44 = vsel %vm502_vm0, %v589_v38, %v588_v37 }
  0xec   :  { %v296_v5 = vpop.xlane.xlu1 %295 }
  0xed   :  { %v293_v6 = vpop.xlane.xlu0 %292  ;;  %v400_v41 = vmul.f32 0.005, %v296_v5 }
  0xee   :  { %v299_v7 = vpop.xlane.xlu2 %298  ;;  %v399_v36 = vmul.f32 0.005, %v293_v6 }
  0xef   :  { %v401_v48 = vmul.f32 0.005, %v299_v7  ;;  %v593_v54 = vperm.slane %v400_v41, %v1696_v29 }
  0xf0   :  { %v591_v43 = vperm.slane %v399_v36, %v1693_v27 }
  0xf1   :  { %v595_v1 = vperm.slane %v401_v48, %v1705_v42 }
  0xf2   :  { %v592_v57 = vsel %vm506_vm1, %v591_v43, %v590_v44 }
  0xf3   :  { %v594_v5 = vsel %vm510_vm2, %v593_v54, %v592_v57  ;;  %v1873_v57 = vshrl.u32 %v497_v17, 7 }
  0xf4   :  { %v305_v8 = vpop.xlane.xlu1 %304  ;;  %v596_v18 = vsel %vm514_vm3, %v595_v1, %v594_v5 }
  0xf5   :  { %v302_v9 = vpop.xlane.xlu0 %301  ;;  %v403_v7 = vmul.f32 0.005, %v305_v8  ;;  %1398 = vset.pattern.permute.xlu1 %v1873_v57 }
  0xf6   :  { %v1793_v10 = vpop.xlane.xlu2 %307  ;;  %v402_v58 = vmul.f32 0.005, %v302_v9 }
  0xf7   :  { %v404_v8 = vmul.f32 0.005, %v1793_v10  ;;  %v599_v25 = vperm.slane %v403_v7, %v1720_v61 }
  0xf8   :  { %v597_v9 = vperm.slane %v402_v58, %v1702_v39  ;;  %v1877_v58 = vadd.s32 16, %v1873_v57 }
  0xfa   :  { %v598_v32 = vsel %vm518_vm4, %v597_v9, %v596_v18  ;;  %1400 = vset.pattern.permute.xlu0 %v1877_v58 }
  0xfc   :  { %v314_v11 = vpop.xlane.xlu1 %313 }
  0xfd   :  { %v311_v13 = vpop.xlane.xlu0 %310  ;;  %v406_v40 = vmul.f32 0.005, %v314_v11 }
  0xfe   :  { %v317_v14 = vpop.xlane.xlu2 %316  ;;  %v405_v15 = vmul.f32 0.005, %v311_v13 }
  0xff   :  { %v407_v45 = vmul.f32 0.005, %v317_v14  ;;  %v604_v49 = vperm.slane %v406_v40, %v1699_v31  ;;  %v600_v40 = vsel %vm522_vm5, %v599_v25, %v598_v32 }
 0x100   :  { %v603_v50 = vperm.slane %v405_v15, %v1690_v21 }
 0x101   :  { %v606_v60 = vperm.slane %v407_v45, %v1693_v27 }
 0x102   :  { %v605_v2 = vsel %vm502_vm0, %v604_v49, %v603_v50 }
 0x103   :  { %v607_v13 = vsel %vm506_vm1, %v606_v60, %v605_v2  ;;  %v1464_v60 = vld [vmem:[%s2044_s4] ss:$0 sm:$0xff]  ;;  %s1652_s4 = smov [#allocation5]  }
 0x104   :  { %v323_v22 = vpop.xlane.xlu1 %322  ;;  %s1375_s18 = sshll.u32 %s1652_s4, 4  ;;  %s1376_s18 = int_to_ptr.vmem [resolvable:$true] %s1375_s18 }
 0x105   :  { %v320_v23 = vpop.xlane.xlu0 %319  ;;  %v409_v62 = vmul.f32 0.005, %v323_v22 }
 0x106   :  { %v326_v24 = vpop.xlane.xlu2 %325  ;;  %v408_v51 = vmul.f32 0.005, %v320_v23 }
 0x107   :  { %v410_v11 = vmul.f32 0.005, %v326_v24 }
 0x108   :  { %v608_v3 = vperm.slane %v408_v51, %v1696_v29 }
 0x109   :  { %v612_v26 = vperm.slane %v410_v11, %v1702_v39 }
 0x10a   :  { %v609_v19 = vsel %vm510_vm2, %v608_v3, %v607_v13 }
 0x10c   :  { %v332_v33 = vpop.xlane.xlu1 %331 }
 0x10d   :  { %v329_v34 = vpop.xlane.xlu0 %328  ;;  %v412_v28 = vmul.f32 0.005, %v332_v33 }
 0x10e   :  { %v335_v35 = vpop.xlane.xlu2 %334 }
 0x10f   :  { %v413_v46 = vmul.f32 0.005, %v335_v35  ;;  %v616_v15 = vperm.slane %v412_v28, %v1716_v55 }
 0x111   :  { %v618_v63 = vperm.slane %v413_v46, %v1690_v21  ;;  %v610_v21 = vperm.slane %v409_v62, %v1705_v42 }
 0x114   :  { %v341_v47 = vpop.xlane.xlu1 %340 }
 0x115   :  { %v338_v52 = vpop.xlane.xlu0 %337  ;;  %v415_v59 = vmul.f32 0.005, %v341_v47 }
 0x116   :  { %v344_v53 = vpop.xlane.xlu2 %343  ;;  %v414_v56 = vmul.f32 0.005, %v338_v52 }
 0x117   :  { %v416_v6 = vmul.f32 0.005, %v344_v53  ;;  %v621_v12 = vperm.slane %v415_v59, %v1693_v27  ;;  %v671_v53 = vld [vmem:[%s2043_s3] sm:$0xf]  ;;  %v1880_v59 = vadd.s32 8, %v1873_v57 }
 0x118   :  { %v619_v0 = vperm.slane %v414_v56, %v1699_v31  ;;  %v411_v31 = vmul.f32 0.005, %v329_v34  ;;  %v611_v34 = vsel %vm514_vm3, %v610_v21, %v609_v19  ;;  %1391 = vmatpush.msk.msra.mxu1 %vm680_vm15, %v671_v53  ;;  %v1901_v19 = vadd.s32 48, %v1873_v57 }
 0x119   :  { %v623_v22 = vperm.slane %v416_v6, %v1696_v29  ;;  %v601_v29 = vperm.slane %v404_v8, %v1716_v55  ;;  %v613_v33 = vsel %vm518_vm4, %v612_v26, %v611_v34  ;;  %1399 = vset.pattern.permute.xlu2 %v1880_v59  ;;  %v1910_v8 = vadd.s32 56, %v1873_v57  ;;  %v1470_v26 = vld [vmem:[#allocation2 + $0x18] sm:$0xff]  ;;  %v1471_v34 = vld [vmem:[#allocation2 + $0x30] sm:$0xff] }
 0x11a   :  { %v620_v14 = vsel %vm502_vm0, %v619_v0, %v618_v63  ;;  %v614_v35 = vperm.slane %v411_v31, %v1720_v61  ;;  %vm676_vm0 = vcmask 31744  }
 0x11b   :  { %v622_v30 = vsel %vm506_vm1, %v621_v12, %v620_v14  ;;  %v602_v45 = vsel %vm526_vm6, %v601_v29, %v600_v40  ;;  %v1891_v14 = vadd.s32 24, %v1873_v57  ;;  %v1474_v40 = vld [vmem:[#allocation2 + $0x28] sm:$0xff] }
 0x11c   :  { %v350_v16 = vpop.xlane.xlu1 %349  ;;  %v624_v37 = vsel %vm510_vm2, %v623_v22, %v622_v30  ;;  %v615_v43 = vsel %vm522_vm5, %v614_v35, %v613_v33  ;;  %v642_v50 = vsel %vm641_vm11, %v602_v45, %v1791_v4 }
 0x11d   :  { %v347_v20 = vpop.xlane.xlu0 %346  ;;  %v418_v24 = vmul.f32 0.005, %v350_v16  ;;  %v1894_v16 = vadd.s32 32, %v1873_v57 }
 0x11e   :  { %v417_v23 = vmul.f32 0.005, %v347_v20  ;;  %v353_v27 = vpop.xlane.xlu2 %352  ;;  %v1904_v20 = vadd.s32 40, %v1873_v57 }
 0x11f   :  { %v419_v36 = vmul.f32 0.005, %v353_v27  ;;  %v627_v38 = vperm.slane %v418_v24, %v1702_v39  ;;  %v617_v39 = vsel %vm526_vm6, %v616_v15, %v615_v43  ;;  %v1469_v27 = vld [vmem:[#allocation2 + $0x10] sm:$0xff] }
 0x120   :  { %v625_v10 = vperm.slane %v417_v23, %v1705_v42  ;;  %v644_v51 = vsel %vm643_vm12, %v617_v39, %v642_v50  ;;  %v1478_v39 = vld [vmem:[#allocation2 + $0x58] sm:$0xff] }
 0x121   :  { %v629_v44 = vperm.slane %v419_v36, %v1720_v61 }
 0x122   :  { %v626_v41 = vsel %vm514_vm3, %v625_v10, %v624_v37  ;;  %v1472_v10 = vld [vmem:[#allocation2 + $0x38] sm:$0xff]  ;;  %v1473_v37 = vld [vmem:[#allocation2 + $0x20] sm:$0xff] }
 0x123   :  { %v628_v46 = vsel %vm518_vm4, %v627_v38, %v626_v41  ;;  %v1475_v41 = vld [vmem:[#allocation2] sm:$0xff] }
 0x124   :  { %v630_v49 = vsel %vm522_vm5, %v629_v44, %v628_v46  ;;  %v1476_v44 = vld [vmem:[#allocation2 + $0x8] sm:$0xff]  ;;  %v1477_v46 = vld [vmem:[#allocation2 + $0x50] sm:$0xff] }
 0x125   :  { %v356_v42 = vpop.xlane.xlu0 %355 }
 0x126   :  { %v420_v47 = vmul.f32 0.005, %v356_v42 }
 0x128   :  { %v631_v48 = vperm.slane %v420_v47, %v1716_v55  ;;  %v1463_v55 = vld [vmem:[%s2042_s2] ss:$0 sm:$0xff] }
 0x12a   :  { %v632_v61 = vsel %vm526_vm6, %v631_v48, %v630_v49 }
 0x12b   :  { %v646_v52 = vsel %vm645_vm13, %v632_v61, %v644_v51  ;;  %v1479_v61 = vld [vmem:[#allocation2 + $0x90] sm:$0xff] }
 0x12c   :  { %1390 = vmatmul.msk.f32.vlgmr.msra.gmra.mxu0 %vm647_vm14, %v646_v52  ;;  %v1480_v52 = vld [vmem:[#allocation2 + $0x98] sm:$0xff] }
 0x1a9   :  { %v667_v54 = vpop.f32.mrf.mxu0 }
 0x1aa   :  { %v668_v56 = vadd.f32 %v1463_v55, %v667_v54  ;;  %v1481_v54 = vld [vmem:[#allocation2 + $0x40] sm:$0xff] }
 0x1ac   :  { %v670_v4 = vmax.f32 %v668_v56, 0.0 }
 0x1ae   :  { %1392 = vmatmul.msk.f32.vlgmr.msra.gmra.mxu1 %vm676_vm0, %v670_v4  ;;  %v1482_v4 = vld [vmem:[#allocation2 + $0x48] sm:$0xff] }
 0x22b   :  { %v701_v62 = vpop.f32.mrf.mxu1 }
 0x22c   :  { %v702_v63 = vadd.f32 %v1464_v60, %v701_v62 }
 0x22e   :  { %v1393_v17 = vmul.f32 -1.442695, %v702_v63  ;;  %v1483_v63 = vld [vmem:[#allocation2 + $0x70] sm:$0xff] }
 0x230   :  { %1465 = vpow2.f32 %v1393_v17 }
 0x236   :  { %v1466_v0 = vpop.eup %1465 }
 0x237   :  { %v707_v1 = vadd.f32 1.0, %v1466_v0  ;;  %v1484_v0 = vld [vmem:[#allocation2 + $0x78] sm:$0xff] }
 0x239   :  { %1467 = vrcp.f32 %v707_v1  ;;  %v719_v6 = vand.u32 2147483648, %v707_v1  ;;  %v717_v9 = vand.u32 2147483647, %v707_v1  ;;  %vm713_vm2 = vweird.f32 %v707_v1 }
 0x23b   :  { %v720_v12 = vor.u32 1.1754944e-38, %v719_v6  ;;  %vm718_vm4 = vcmp.eq.f32.partialorder %v717_v9, 8.507059e+37 }
 0x23f   :  { %v1468_v2 = vpop.eup %1467 }
 0x240   :  { %v709_v3 = vmul.f32 %v1468_v2, %v707_v1  ;;  %vm714_vm1 = vweird.f32 %v1468_v2 }
 0x241   :  { %vm715_vm3 = vmor %vm713_vm2, %vm714_vm1 }
 0x242   :  { %v710_v5 = vsub.f32 1.0, %v709_v3 }
 0x244   :  { %v711_v7 = vmul.f32 %v1468_v2, %v710_v5  ;;  %v1485_v5 = vld [vmem:[#allocation2 + $0xe0] sm:$0xff] }
 0x246   :  { %v712_v11 = vadd.f32 %v1468_v2, %v711_v7  ;;  %v1486_v7 = vld [vmem:[#allocation2 + $0xe8] sm:$0xff] }
 0x248   :  { %v716_v13 = vsel %vm715_vm3, %v1468_v2, %v712_v11 }
 0x249   :  { %v1887_v21 = vsel %vm718_vm4, %v720_v12, %v716_v13  ;;  %v1487_v12 = vld [vmem:[#allocation2 + $0x60] sm:$0xff] }
 0x24a   :  { %v723_v31 = vperm.slane %v1887_v21, 0  ;;  %v772_v18 = vperm.slane %v1887_v21, 1  ;;  %v1916_v22 = vperm.slane %v1887_v21, 2  ;;  %v1923_v23 = vperm.slane %v1887_v21, 3 }
 0x24b   :  { %v1934_v30 = vperm.slane %v1887_v21, 4  ;;  %v1948_v49 = vperm.slane %v1887_v21, 5  ;;  %v1957_v2 = vperm.slane %v1887_v21, 6 }
 0x24c   :  { %740 = vperm.xlu0 %1400, %v723_v31   ;;  %734 = vperm.xlu2 %1399, %v723_v31  }
 0x24d   :  { %728 = vperm.xlu1 %1398, %v723_v31  }
 0x254   :  { %1407 = vset.pattern.permute.xlu0 %v1880_v59  ;;  %1401 = vset.pattern.permute.xlu2 %v1891_v14 }
 0x255   :  { %1402 = vset.pattern.permute.xlu1 %v1894_v16 }
 0x25c   :  { %783 = vperm.xlu0 %1407, %v772_v18   ;;  %746 = vperm.xlu2 %1401, %v723_v31  }
 0x25d   :  { %752 = vperm.xlu1 %1402, %v723_v31  }
 0x264   :  { %1412 = vset.pattern.permute.xlu0 %v1901_v19  ;;  %1403 = vset.pattern.permute.xlu2 %v1904_v20 }
 0x265   :  { %1404 = vset.pattern.permute.xlu1 %v1901_v19 }
 0x26c   :  { %813 = vperm.xlu0 %1412, %v772_v18   ;;  %758 = vperm.xlu2 %1403, %v723_v31  }
 0x26d   :  { %764 = vperm.xlu1 %1404, %v723_v31  }
 0x274   :  { %1417 = vset.pattern.permute.xlu0 %v1891_v14  ;;  %1405 = vset.pattern.permute.xlu2 %v1910_v8 }
 0x275   :  { %1406 = vset.pattern.permute.xlu1 %v1873_v57 }
 0x27c   :  { %844 = vperm.xlu0 %1417, %v1916_v22   ;;  %770 = vperm.xlu2 %1405, %v723_v31   ;;  %v1488_v31 = vld [vmem:[#allocation2 + $0x68] sm:$0xff] }
 0x27d   :  { %777 = vperm.xlu1 %1406, %v772_v18  }
 0x284   :  { %1422 = vset.pattern.permute.xlu0 %v1873_v57  ;;  %1408 = vset.pattern.permute.xlu2 %v1877_v58 }
 0x285   :  { %1409 = vset.pattern.permute.xlu1 %v1891_v14 }
 0x28c   :  { %875 = vperm.xlu0 %1422, %v1923_v23   ;;  %789 = vperm.xlu2 %1408, %v772_v18  }
 0x28d   :  { %795 = vperm.xlu1 %1409, %v772_v18  }
 0x294   :  { %1427 = vset.pattern.permute.xlu0 %v1904_v20  ;;  %1410 = vset.pattern.permute.xlu2 %v1894_v16 }
 0x295   :  { %1411 = vset.pattern.permute.xlu1 %v1904_v20 }
 0x29c   :  { %905 = vperm.xlu0 %1427, %v1923_v23   ;;  %801 = vperm.xlu2 %1410, %v772_v18  }
 0x29d   :  { %807 = vperm.xlu1 %1411, %v772_v18  }
 0x2a4   :  { %1432 = vset.pattern.permute.xlu0 %v1877_v58  ;;  %1413 = vset.pattern.permute.xlu2 %v1910_v8 }
 0x2a5   :  { %1414 = vset.pattern.permute.xlu1 %v1873_v57 }
 0x2a6   :  { %v735_v24 = vpop.permute.xlu2 %734 }
 0x2a7   :  { %v1117_v25 = vmul.f32 %v1469_v27, %v735_v24  ;;  %v1118_v28 = vmul.f32 %v1470_v26, %v735_v24  ;;  %v1489_v24 = vld [vmem:[#allocation2 + $0xa0] sm:$0xff] }
 0x2a9   :  { %1245 = vst [vmem:[#allocation5 + $0x10] sm:$0xff] %v1117_v25  ;;  %v1490_v25 = vld [vmem:[#allocation2 + $0xa8] sm:$0xff] }
 0x2aa   :  { %1246 = vst [vmem:[#allocation5 + $0x18] sm:$0xff] %v1118_v28 }
 0x2ac   :  { %936 = vperm.xlu0 %1432, %v1934_v30   ;;  %819 = vperm.xlu2 %1413, %v772_v18  }
 0x2ad   :  { %826 = vperm.xlu1 %1414, %v1916_v22  }
 0x2b4   :  { %1437 = vset.pattern.permute.xlu0 %v1910_v8  ;;  %1415 = vset.pattern.permute.xlu2 %v1880_v59 }
 0x2b5   :  { %1416 = vset.pattern.permute.xlu1 %v1877_v58 }
 0x2b6   :  { %v747_v32 = vpop.permute.xlu2 %746 }
 0x2b7   :  { %v1121_v35 = vmul.f32 %v1471_v34, %v747_v32  ;;  %v1122_v36 = vmul.f32 %v1472_v10, %v747_v32  ;;  %v1491_v32 = vld [vmem:[#allocation2 + $0x130] sm:$0xff] }
 0x2b9   :  { %1249 = vst [vmem:[#allocation5 + $0x30] sm:$0xff] %v1121_v35  ;;  %v1492_v35 = vld [vmem:[#allocation2 + $0x138] sm:$0xff] }
 0x2ba   :  { %1250 = vst [vmem:[#allocation5 + $0x38] sm:$0xff] %v1122_v36 }
 0x2bc   :  { %966 = vperm.xlu0 %1437, %v1934_v30   ;;  %832 = vperm.xlu2 %1415, %v1916_v22  }
 0x2bd   :  { %838 = vperm.xlu1 %1416, %v1916_v22  }
 0x2be   :  { %v741_v29 = vpop.permute.xlu0 %740 }
 0x2bf   :  { %v1119_v38 = vmul.f32 %v1473_v37, %v741_v29  ;;  %v1120_v33 = vmul.f32 %v1474_v40, %v741_v29  ;;  %v729_v15 = vpop.permute.xlu1 %728  ;;  %v1493_v29 = vld [vmem:[#allocation2 + $0x80] sm:$0xff] }
 0x2c0   :  { %v1115_v43 = vmul.f32 %v1475_v41, %v729_v15  ;;  %v1116_v42 = vmul.f32 %v1476_v44, %v729_v15  ;;  %v1495_v15 = vld [vmem:[#allocation2 + $0xc0] sm:$0xff] }
 0x2c1   :  { %1247 = vst [vmem:[#allocation5 + $0x20] sm:$0xff] %v1119_v38  ;;  %v1494_v38 = vld [vmem:[#allocation2 + $0x88] sm:$0xff] }
 0x2c2   :  { %1248 = vst [vmem:[#allocation5 + $0x28] sm:$0xff] %v1120_v33 }
 0x2c3   :  { %1243 = vst [vmem:[#allocation5] sm:$0xff] %v1115_v43  ;;  %v1496_v43 = vld [vmem:[#allocation2 + $0xc8] sm:$0xff] }
 0x2c4   :  { %1244 = vst [vmem:[#allocation5 + $0x8] sm:$0xff] %v1116_v42  ;;  %1442 = vset.pattern.permute.xlu0 %v1894_v16  ;;  %1418 = vset.pattern.permute.xlu2 %v1894_v16  ;;  %v1972_v42 = vperm.slane %v1887_v21, 7 }
 0x2c5   :  { %1419 = vset.pattern.permute.xlu1 %v1904_v20 }
 0x2c6   :  { %v759_v45 = vpop.permute.xlu2 %758 }
 0x2c7   :  { %v1125_v47 = vmul.f32 %v1477_v46, %v759_v45  ;;  %v1126_v48 = vmul.f32 %v1478_v39, %v759_v45  ;;  %v1497_v46 = vld [vmem:[#allocation2 + $0x180] sm:$0xff]  ;;  %v1498_v39 = vld [vmem:[#allocation2 + $0x188] sm:$0xff] }
 0x2c9   :  { %1253 = vst [vmem:[#allocation5 + $0x50] sm:$0xff] %v1125_v47 }
 0x2ca   :  { %1254 = vst [vmem:[#allocation5 + $0x58] sm:$0xff] %v1126_v48 }
 0x2cc   :  { %997 = vperm.xlu0 %1442, %v1948_v49   ;;  %850 = vperm.xlu2 %1418, %v1916_v22  }
 0x2cd   :  { %856 = vperm.xlu1 %1419, %v1916_v22  }
 0x2ce   :  { %v784_v50 = vpop.permute.xlu0 %783 }
 0x2cf   :  { %v1133_v51 = vmul.f32 %v1479_v61, %v784_v50  ;;  %v1134_v53 = vmul.f32 %v1480_v52, %v784_v50  ;;  %v753_v55 = vpop.permute.xlu1 %752  ;;  %v1499_v61 = vld [vmem:[#allocation2 + $0xb0] sm:$0xff]  ;;  %v1500_v52 = vld [vmem:[#allocation2 + $0xb8] sm:$0xff] }
 0x2d0   :  { %v1123_v56 = vmul.f32 %v1481_v54, %v753_v55  ;;  %v1124_v60 = vmul.f32 %v1482_v4, %v753_v55  ;;  %v1501_v55 = vld [vmem:[#allocation2 + $0xf0] sm:$0xff] }
 0x2d1   :  { %1261 = vst [vmem:[#allocation5 + $0x90] sm:$0xff] %v1133_v51 }
 0x2d2   :  { %1262 = vst [vmem:[#allocation5 + $0x98] sm:$0xff] %v1134_v53 }
 0x2d3   :  { %1251 = vst [vmem:[#allocation5 + $0x40] sm:$0xff] %v1123_v56  ;;  %v1502_v56 = vld [vmem:[#allocation2 + $0xf8] sm:$0xff] }
 0x2d4   :  { %1252 = vst [vmem:[#allocation5 + $0x48] sm:$0xff] %v1124_v60  ;;  %1447 = vset.pattern.permute.xlu0 %v1880_v59  ;;  %1420 = vset.pattern.permute.xlu2 %v1901_v19 }
 0x2d5   :  { %1421 = vset.pattern.permute.xlu1 %v1910_v8 }
 0x2d6   :  { %v771_v62 = vpop.permute.xlu2 %770 }
 0x2d7   :  { %v1129_v17 = vmul.f32 %v1483_v63, %v771_v62  ;;  %v1130_v1 = vmul.f32 %v1484_v0, %v771_v62  ;;  %v1503_v62 = vld [vmem:[#allocation2 + $0x1d0] sm:$0xff] }
 0x2d9   :  { %1257 = vst [vmem:[#allocation5 + $0x70] sm:$0xff] %v1129_v17  ;;  %v1504_v17 = vld [vmem:[#allocation2 + $0x1d8] sm:$0xff] }
 0x2da   :  { %1258 = vst [vmem:[#allocation5 + $0x78] sm:$0xff] %v1130_v1 }
 0x2dc   :  { %1028 = vperm.xlu0 %1447, %v1957_v2   ;;  %862 = vperm.xlu2 %1420, %v1916_v22  }
 0x2dd   :  { %868 = vperm.xlu1 %1421, %v1916_v22  }
 0x2de   :  { %v814_v3 = vpop.permute.xlu0 %813 }
 0x2df   :  { %v1143_v6 = vmul.f32 %v1485_v5, %v814_v3  ;;  %v1144_v9 = vmul.f32 %v1486_v7, %v814_v3  ;;  %v765_v11 = vpop.permute.xlu1 %764  ;;  %v1505_v3 = vld [vmem:[#allocation2 + $0xd0] sm:$0xff] }
 0x2e0   :  { %v1127_v13 = vmul.f32 %v1487_v12, %v765_v11  ;;  %v1128_v18 = vmul.f32 %v1488_v31, %v765_v11  ;;  %v1508_v12 = vld [vmem:[#allocation2 + $0x118] sm:$0xff] }
 0x2e1   :  { %1271 = vst [vmem:[#allocation5 + $0xe0] sm:$0xff] %v1143_v6  ;;  %v1506_v6 = vld [vmem:[#allocation2 + $0xd8] sm:$0xff] }
 0x2e2   :  { %1272 = vst [vmem:[#allocation5 + $0xe8] sm:$0xff] %v1144_v9 }
 0x2e3   :  { %1255 = vst [vmem:[#allocation5 + $0x60] sm:$0xff] %v1127_v13 }
 0x2e4   :  { %1256 = vst [vmem:[#allocation5 + $0x68] sm:$0xff] %v1128_v18  ;;  %1452 = vset.pattern.permute.xlu0 %v1901_v19  ;;  %1423 = vset.pattern.permute.xlu2 %v1880_v59  ;;  %v1509_v18 = vld [vmem:[#allocation2 + $0x220] sm:$0xff] }
 0x2e5   :  { %1424 = vset.pattern.permute.xlu1 %v1877_v58 }
 0x2e6   :  { %v790_v22 = vpop.permute.xlu2 %789 }
 0x2e7   :  { %v1135_v27 = vmul.f32 %v1489_v24, %v790_v22  ;;  %v1136_v26 = vmul.f32 %v1490_v25, %v790_v22  ;;  %v1510_v24 = vld [vmem:[#allocation2 + $0x228] sm:$0xff] }
 0x2e9   :  { %1263 = vst [vmem:[#allocation5 + $0xa0] sm:$0xff] %v1135_v27 }
 0x2ea   :  { %1264 = vst [vmem:[#allocation5 + $0xa8] sm:$0xff] %v1136_v26  ;;  %v1511_v26 = vld [vmem:[#allocation2 + $0x100] sm:$0xff] }
 0x2ec   :  { %1058 = vperm.xlu0 %1452, %v1957_v2   ;;  %881 = vperm.xlu2 %1423, %v1923_v23  }
 0x2ed   :  { %887 = vperm.xlu1 %1424, %v1923_v23  }
 0x2ee   :  { %v845_v28 = vpop.permute.xlu0 %844 }
 0x2ef   :  { %v1153_v34 = vmul.f32 %v1491_v32, %v845_v28  ;;  %v1154_v10 = vmul.f32 %v1492_v35, %v845_v28  ;;  %v778_v36 = vpop.permute.xlu1 %777  ;;  %v1512_v32 = vld [vmem:[#allocation2 + $0x108] sm:$0xff] }
 0x2f0   :  { %v1131_v37 = vmul.f32 %v1493_v29, %v778_v36  ;;  %v1132_v40 = vmul.f32 %v1494_v38, %v778_v36  ;;  %v1514_v29 = vld [vmem:[#allocation2 + $0x148] sm:$0xff] }
 0x2f1   :  { %1281 = vst [vmem:[#allocation5 + $0x130] sm:$0xff] %v1153_v34 }
 0x2f2   :  { %1282 = vst [vmem:[#allocation5 + $0x138] sm:$0xff] %v1154_v10  ;;  %v1513_v10 = vld [vmem:[#allocation2 + $0x140] sm:$0xff] }
 0x2f3   :  { %1259 = vst [vmem:[#allocation5 + $0x80] sm:$0xff] %v1131_v37 }
 0x2f4   :  { %1260 = vst [vmem:[#allocation5 + $0x88] sm:$0xff] %v1132_v40  ;;  %1457 = vset.pattern.permute.xlu0 %v1891_v14  ;;  %1425 = vset.pattern.permute.xlu2 %v1891_v14  ;;  %v1515_v40 = vld [vmem:[#allocation2 + $0x270] sm:$0xff] }
 0x2f5   :  { %1426 = vset.pattern.permute.xlu1 %v1894_v16 }
 0x2f6   :  { %v802_v33 = vpop.permute.xlu2 %801 }
 0x2f7   :  { %v1139_v41 = vmul.f32 %v1495_v15, %v802_v33  ;;  %v1140_v44 = vmul.f32 %v1496_v43, %v802_v33  ;;  %v1516_v15 = vld [vmem:[#allocation2 + $0x278] sm:$0xff] }
 0x2f9   :  { %1267 = vst [vmem:[#allocation5 + $0xc0] sm:$0xff] %v1139_v41 }
 0x2fa   :  { %1268 = vst [vmem:[#allocation5 + $0xc8] sm:$0xff] %v1140_v44  ;;  %v1517_v44 = vld [vmem:[#allocation2 + $0x120] sm:$0xff] }
 0x2fc   :  { %1089 = vperm.xlu0 %1457, %v1972_v42   ;;  %893 = vperm.xlu2 %1425, %v1923_v23  }
 0x2fd   :  { %899 = vperm.xlu1 %1426, %v1923_v23  }
 0x2fe   :  { %v876_v45 = vpop.permute.xlu0 %875 }
 0x2ff   :  { %v1163_v47 = vmul.f32 %v1497_v46, %v876_v45  ;;  %v1164_v48 = vmul.f32 %v1498_v39, %v876_v45  ;;  %v796_v50 = vpop.permute.xlu1 %795  ;;  %v1518_v46 = vld [vmem:[#allocation2 + $0x128] sm:$0xff] }
 0x300   :  { %v1137_v51 = vmul.f32 %v1499_v61, %v796_v50  ;;  %v1138_v53 = vmul.f32 %v1500_v52, %v796_v50  ;;  %v1520_v61 = vld [vmem:[#allocation2 + $0x168] sm:$0xff] }
 0x301   :  { %1291 = vst [vmem:[#allocation5 + $0x180] sm:$0xff] %v1163_v47 }
 0x302   :  { %1292 = vst [vmem:[#allocation5 + $0x188] sm:$0xff] %v1164_v48  ;;  %v1519_v48 = vld [vmem:[#allocation2 + $0x160] sm:$0xff] }
 0x303   :  { %1265 = vst [vmem:[#allocation5 + $0xb0] sm:$0xff] %v1137_v51 }
 0x304   :  { %1266 = vst [vmem:[#allocation5 + $0xb8] sm:$0xff] %v1138_v53  ;;  %1428 = vset.pattern.permute.xlu2 %v1901_v19  ;;  %1462 = vset.pattern.permute.xlu0 %v1910_v8  ;;  %v1521_v53 = vld [vmem:[#allocation2 + $0x2c0] sm:$0xff] }
 0x305   :  { %1429 = vset.pattern.permute.xlu1 %v1910_v8 }
 0x306   :  { %v820_v21 = vpop.permute.xlu2 %819 }
 0x307   :  { %v1145_v54 = vmul.f32 %v1501_v55, %v820_v21  ;;  %v1146_v4 = vmul.f32 %v1502_v56, %v820_v21  ;;  %v1522_v55 = vld [vmem:[#allocation2 + $0x2c8] sm:$0xff] }
 0x309   :  { %1273 = vst [vmem:[#allocation5 + $0xf0] sm:$0xff] %v1145_v54 }
 0x30a   :  { %1274 = vst [vmem:[#allocation5 + $0xf8] sm:$0xff] %v1146_v4  ;;  %v1523_v4 = vld [vmem:[#allocation2 + $0x150] sm:$0xff] }
 0x30c   :  { %911 = vperm.xlu2 %1428, %v1923_v23  }
 0x30d   :  { %917 = vperm.xlu1 %1429, %v1923_v23   ;;  %v1507_v23 = vld [vmem:[#allocation2 + $0x110] sm:$0xff] }
 0x30e   :  { %v906_v60 = vpop.permute.xlu0 %905 }
 0x30f   :  { %v1173_v63 = vmul.f32 %v1503_v62, %v906_v60  ;;  %v1174_v0 = vmul.f32 %v1504_v17, %v906_v60  ;;  %v808_v1 = vpop.permute.xlu1 %807  ;;  %v1524_v62 = vld [vmem:[#allocation2 + $0x158] sm:$0xff] }
 0x310   :  { %v1141_v5 = vmul.f32 %v1505_v3, %v808_v1  ;;  %v1142_v7 = vmul.f32 %v1506_v6, %v808_v1  ;;  %v1526_v1 = vld [vmem:[#allocation2 + $0x198] sm:$0xff]  ;;  %v1527_v6 = vld [vmem:[#allocation2 + $0x310] sm:$0xff] }
 0x311   :  { %1301 = vst [vmem:[#allocation5 + $0x1d0] sm:$0xff] %v1173_v63 }
 0x312   :  { %1302 = vst [vmem:[#allocation5 + $0x1d8] sm:$0xff] %v1174_v0 }
 0x313   :  { %1269 = vst [vmem:[#allocation5 + $0xd0] sm:$0xff] %v1141_v5 }
 0x314   :  { %1270 = vst [vmem:[#allocation5 + $0xd8] sm:$0xff] %v1142_v7  ;;  %1430 = vset.pattern.permute.xlu2 %v1873_v57 }
 0x315   :  { %1431 = vset.pattern.permute.xlu1 %v1880_v59 }
 0x316   :  { %v833_v9 = vpop.permute.xlu2 %832 }
 0x317   :  { %v1149_v11 = vmul.f32 %v1507_v23, %v833_v9  ;;  %v1150_v13 = vmul.f32 %v1508_v12, %v833_v9  ;;  %v1528_v9 = vld [vmem:[#allocation2 + $0x318] sm:$0xff]  ;;  %v1529_v12 = vld [vmem:[#allocation2 + $0x170] sm:$0xff] }
 0x319   :  { %1277 = vst [vmem:[#allocation5 + $0x110] sm:$0xff] %v1149_v11 }
 0x31a   :  { %1278 = vst [vmem:[#allocation5 + $0x118] sm:$0xff] %v1150_v13 }
 0x31c   :  { %924 = vperm.xlu2 %1430, %v1934_v30  }
 0x31d   :  { %930 = vperm.xlu1 %1431, %v1934_v30  }
 0x31e   :  { %v937_v31 = vpop.permute.xlu0 %936 }
 0x31f   :  { %v1183_v22 = vmul.f32 %v1509_v18, %v937_v31  ;;  %v1184_v27 = vmul.f32 %v1510_v24, %v937_v31  ;;  %v827_v25 = vpop.permute.xlu1 %826  ;;  %v1530_v31 = vld [vmem:[#allocation2 + $0x178] sm:$0xff]  ;;  %v1531_v24 = vld [vmem:[#allocation2 + $0x1b0] sm:$0xff] }
 0x320   :  { %v1147_v28 = vmul.f32 %v1511_v26, %v827_v25  ;;  %v1148_v34 = vmul.f32 %v1512_v32, %v827_v25  ;;  %v1532_v25 = vld [vmem:[#allocation2 + $0x1b8] sm:$0xff]  ;;  %v1533_v32 = vld [vmem:[#allocation2 + $0x360] sm:$0xff] }
 0x321   :  { %1311 = vst [vmem:[#allocation5 + $0x220] sm:$0xff] %v1183_v22 }
 0x322   :  { %1312 = vst [vmem:[#allocation5 + $0x228] sm:$0xff] %v1184_v27 }
 0x323   :  { %1275 = vst [vmem:[#allocation5 + $0x100] sm:$0xff] %v1147_v28 }
 0x324   :  { %1276 = vst [vmem:[#allocation5 + $0x108] sm:$0xff] %v1148_v34  ;;  %1433 = vset.pattern.permute.xlu2 %v1891_v14 }
 0x325   :  { %1434 = vset.pattern.permute.xlu1 %v1894_v16 }
 0x326   :  { %v851_v35 = vpop.permute.xlu2 %850 }
 0x327   :  { %v1155_v36 = vmul.f32 %v1513_v10, %v851_v35  ;;  %v1156_v37 = vmul.f32 %v1514_v29, %v851_v35  ;;  %v1534_v35 = vld [vmem:[#allocation2 + $0x368] sm:$0xff]  ;;  %v1535_v29 = vld [vmem:[#allocation2 + $0x1a0] sm:$0xff] }
 0x329   :  { %1283 = vst [vmem:[#allocation5 + $0x140] sm:$0xff] %v1155_v36 }
 0x32a   :  { %1284 = vst [vmem:[#allocation5 + $0x148] sm:$0xff] %v1156_v37 }
 0x32c   :  { %942 = vperm.xlu2 %1433, %v1934_v30  }
 0x32d   :  { %948 = vperm.xlu1 %1434, %v1934_v30  }
 0x32e   :  { %v967_v38 = vpop.permute.xlu0 %966 }
 0x32f   :  { %v1193_v33 = vmul.f32 %v1515_v40, %v967_v38  ;;  %v1194_v41 = vmul.f32 %v1516_v15, %v967_v38  ;;  %v839_v43 = vpop.permute.xlu1 %838  ;;  %v1536_v38 = vld [vmem:[#allocation2 + $0x1a8] sm:$0xff]  ;;  %v1537_v15 = vld [vmem:[#allocation2 + $0x1e0] sm:$0xff] }
 0x330   :  { %v1151_v45 = vmul.f32 %v1517_v44, %v839_v43  ;;  %v1152_v47 = vmul.f32 %v1518_v46, %v839_v43  ;;  %v1538_v43 = vld [vmem:[#allocation2 + $0x1e8] sm:$0xff]  ;;  %v1539_v46 = vld [vmem:[#allocation2 + $0x3b0] sm:$0xff] }
 0x331   :  { %1321 = vst [vmem:[#allocation5 + $0x270] sm:$0xff] %v1193_v33 }
 0x332   :  { %1322 = vst [vmem:[#allocation5 + $0x278] sm:$0xff] %v1194_v41 }
 0x333   :  { %1279 = vst [vmem:[#allocation5 + $0x120] sm:$0xff] %v1151_v45 }
 0x334   :  { %1280 = vst [vmem:[#allocation5 + $0x128] sm:$0xff] %v1152_v47  ;;  %1435 = vset.pattern.permute.xlu2 %v1904_v20 }
 0x335   :  { %1436 = vset.pattern.permute.xlu1 %v1901_v19 }
 0x336   :  { %v863_v39 = vpop.permute.xlu2 %862 }
 0x337   :  { %v1159_v50 = vmul.f32 %v1519_v48, %v863_v39  ;;  %v1160_v51 = vmul.f32 %v1520_v61, %v863_v39  ;;  %v1540_v39 = vld [vmem:[#allocation2 + $0x3b8] sm:$0xff]  ;;  %v1541_v61 = vld [vmem:[#allocation2 + $0x1c0] sm:$0xff] }
 0x339   :  { %1287 = vst [vmem:[#allocation5 + $0x160] sm:$0xff] %v1159_v50 }
 0x33a   :  { %1288 = vst [vmem:[#allocation5 + $0x168] sm:$0xff] %v1160_v51 }
 0x33c   :  { %954 = vperm.xlu2 %1435, %v1934_v30  }
 0x33d   :  { %960 = vperm.xlu1 %1436, %v1934_v30   ;;  %v1525_v30 = vld [vmem:[#allocation2 + $0x190] sm:$0xff] }
 0x33e   :  { %v998_v52 = vpop.permute.xlu0 %997 }
 0x33f   :  { %v1203_v21 = vmul.f32 %v1521_v53, %v998_v52  ;;  %v1204_v54 = vmul.f32 %v1522_v55, %v998_v52  ;;  %v857_v56 = vpop.permute.xlu1 %856  ;;  %v1542_v52 = vld [vmem:[#allocation2 + $0x1c8] sm:$0xff]  ;;  %v1543_v55 = vld [vmem:[#allocation2 + $0x200] sm:$0xff] }
 0x340   :  { %v1157_v60 = vmul.f32 %v1523_v4, %v857_v56  ;;  %v1158_v63 = vmul.f32 %v1524_v62, %v857_v56  ;;  %v1544_v56 = vld [vmem:[#allocation2 + $0x208] sm:$0xff]  ;;  %v1545_v62 = vld [vmem:[#allocation2 + $0x1f0] sm:$0xff] }
 0x341   :  { %1331 = vst [vmem:[#allocation5 + $0x2c0] sm:$0xff] %v1203_v21 }
 0x342   :  { %1332 = vst [vmem:[#allocation5 + $0x2c8] sm:$0xff] %v1204_v54 }
 0x343   :  { %1285 = vst [vmem:[#allocation5 + $0x150] sm:$0xff] %v1157_v60 }
 0x344   :  { %1286 = vst [vmem:[#allocation5 + $0x158] sm:$0xff] %v1158_v63  ;;  %1438 = vset.pattern.permute.xlu2 %v1873_v57 }
 0x345   :  { %1439 = vset.pattern.permute.xlu1 %v1880_v59 }
 0x346   :  { %v882_v17 = vpop.permute.xlu2 %881 }
 0x347   :  { %v1165_v0 = vmul.f32 %v1525_v30, %v882_v17  ;;  %v1166_v3 = vmul.f32 %v1526_v1, %v882_v17  ;;  %v1546_v17 = vld [vmem:[#allocation2 + $0x1f8] sm:$0xff]  ;;  %v1547_v1 = vld [vmem:[#allocation2 + $0x230] sm:$0xff] }
 0x349   :  { %1293 = vst [vmem:[#allocation5 + $0x190] sm:$0xff] %v1165_v0 }
 0x34a   :  { %1294 = vst [vmem:[#allocation5 + $0x198] sm:$0xff] %v1166_v3 }
 0x34c   :  { %973 = vperm.xlu2 %1438, %v1948_v49  }
 0x34d   :  { %979 = vperm.xlu1 %1439, %v1948_v49  }
 0x34e   :  { %v1029_v5 = vpop.permute.xlu0 %1028 }
 0x34f   :  { %v1213_v7 = vmul.f32 %v1527_v6, %v1029_v5  ;;  %v1214_v23 = vmul.f32 %v1528_v9, %v1029_v5  ;;  %v869_v11 = vpop.permute.xlu1 %868  ;;  %v1548_v5 = vld [vmem:[#allocation2 + $0x238] sm:$0xff] }
 0x350   :  { %v1161_v13 = vmul.f32 %v1529_v12, %v869_v11  ;;  %v1162_v18 = vmul.f32 %v1530_v31, %v869_v11  ;;  %v1551_v12 = vld [vmem:[#allocation2 + $0x250] sm:$0xff]  ;;  %v1552_v31 = vld [vmem:[#allocation2 + $0x258] sm:$0xff] }
 0x351   :  { %1341 = vst [vmem:[#allocation5 + $0x310] sm:$0xff] %v1213_v7  ;;  %v1549_v7 = vld [vmem:[#allocation2 + $0x210] sm:$0xff] }
 0x352   :  { %1342 = vst [vmem:[#allocation5 + $0x318] sm:$0xff] %v1214_v23  ;;  %v1550_v23 = vld [vmem:[#allocation2 + $0x218] sm:$0xff] }
 0x353   :  { %1289 = vst [vmem:[#allocation5 + $0x170] sm:$0xff] %v1161_v13 }
 0x354   :  { %1290 = vst [vmem:[#allocation5 + $0x178] sm:$0xff] %v1162_v18  ;;  %1440 = vset.pattern.permute.xlu2 %v1877_v58 }
 0x355   :  { %1441 = vset.pattern.permute.xlu1 %v1891_v14 }
 0x356   :  { %v894_v22 = vpop.permute.xlu2 %893 }
 0x357   :  { %v1169_v27 = vmul.f32 %v1531_v24, %v894_v22  ;;  %v1170_v26 = vmul.f32 %v1532_v25, %v894_v22  ;;  %v1553_v24 = vld [vmem:[#allocation2 + $0x240] sm:$0xff]  ;;  %v1554_v25 = vld [vmem:[#allocation2 + $0x248] sm:$0xff] }
 0x359   :  { %1297 = vst [vmem:[#allocation5 + $0x1b0] sm:$0xff] %v1169_v27 }
 0x35a   :  { %1298 = vst [vmem:[#allocation5 + $0x1b8] sm:$0xff] %v1170_v26 }
 0x35c   :  { %985 = vperm.xlu2 %1440, %v1948_v49  }
 0x35d   :  { %991 = vperm.xlu1 %1441, %v1948_v49  }
 0x35e   :  { %v1059_v28 = vpop.permute.xlu0 %1058 }
 0x35f   :  { %v1223_v34 = vmul.f32 %v1533_v32, %v1059_v28  ;;  %v1224_v10 = vmul.f32 %v1534_v35, %v1059_v28  ;;  %v888_v36 = vpop.permute.xlu1 %887  ;;  %v1555_v32 = vld [vmem:[#allocation2 + $0x280] sm:$0xff]  ;;  %v1556_v35 = vld [vmem:[#allocation2 + $0x288] sm:$0xff] }
 0x360   :  { %v1167_v37 = vmul.f32 %v1535_v29, %v888_v36  ;;  %v1168_v40 = vmul.f32 %v1536_v38, %v888_v36  ;;  %v1557_v29 = vld [vmem:[#allocation2 + $0x260] sm:$0xff]  ;;  %v1558_v38 = vld [vmem:[#allocation2 + $0x268] sm:$0xff] }
 0x361   :  { %1351 = vst [vmem:[#allocation5 + $0x360] sm:$0xff] %v1223_v34 }
 0x362   :  { %1352 = vst [vmem:[#allocation5 + $0x368] sm:$0xff] %v1224_v10 }
 0x363   :  { %1295 = vst [vmem:[#allocation5 + $0x1a0] sm:$0xff] %v1167_v37 }
 0x364   :  { %1296 = vst [vmem:[#allocation5 + $0x1a8] sm:$0xff] %v1168_v40  ;;  %1443 = vset.pattern.permute.xlu2 %v1904_v20 }
 0x365   :  { %1444 = vset.pattern.permute.xlu1 %v1901_v19 }
 0x366   :  { %v912_v33 = vpop.permute.xlu2 %911 }
 0x367   :  { %v1175_v41 = vmul.f32 %v1537_v15, %v912_v33  ;;  %v1176_v44 = vmul.f32 %v1538_v43, %v912_v33  ;;  %v1559_v33 = vld [vmem:[#allocation2 + $0x2a0] sm:$0xff] }
 0x369   :  { %1303 = vst [vmem:[#allocation5 + $0x1e0] sm:$0xff] %v1175_v41  ;;  %v1560_v41 = vld [vmem:[#allocation2 + $0x2a8] sm:$0xff] }
 0x36a   :  { %1304 = vst [vmem:[#allocation5 + $0x1e8] sm:$0xff] %v1176_v44  ;;  %v1561_v44 = vld [vmem:[#allocation2 + $0x290] sm:$0xff] }
 0x36c   :  { %1003 = vperm.xlu2 %1443, %v1948_v49  }
 0x36d   :  { %1009 = vperm.xlu1 %1444, %v1948_v49  }
 0x36e   :  { %v1090_v45 = vpop.permute.xlu0 %1089 }
 0x36f   :  { %v1233_v47 = vmul.f32 %v1539_v46, %v1090_v45  ;;  %v1234_v48 = vmul.f32 %v1540_v39, %v1090_v45  ;;  %v900_v50 = vpop.permute.xlu1 %899  ;;  %v1562_v46 = vld [vmem:[#allocation2 + $0x298] sm:$0xff] }
 0x370   :  { %v1171_v51 = vmul.f32 %v1541_v61, %v900_v50  ;;  %v1172_v53 = vmul.f32 %v1542_v52, %v900_v50 }
 0x371   :  { %1361 = vst [vmem:[#allocation5 + $0x3b0] sm:$0xff] %v1233_v47 }
 0x372   :  { %1362 = vst [vmem:[#allocation5 + $0x3b8] sm:$0xff] %v1234_v48  ;;  %v1564_v48 = vld [vmem:[#allocation2 + $0x2d8] sm:$0xff] }
 0x373   :  { %1299 = vst [vmem:[#allocation5 + $0x1c0] sm:$0xff] %v1171_v51  ;;  %v1565_v51 = vld [vmem:[#allocation2 + $0x2b0] sm:$0xff] }
 0x374   :  { %1300 = vst [vmem:[#allocation5 + $0x1c8] sm:$0xff] %v1172_v53  ;;  %1445 = vset.pattern.permute.xlu2 %v1910_v8  ;;  %v1566_v53 = vld [vmem:[#allocation2 + $0x2b8] sm:$0xff] }
 0x375   :  { %1446 = vset.pattern.permute.xlu1 %v1873_v57 }
 0x376   :  { %v925_v21 = vpop.permute.xlu2 %924 }
 0x377   :  { %v1179_v54 = vmul.f32 %v1543_v55, %v925_v21  ;;  %v1180_v4 = vmul.f32 %v1544_v56, %v925_v21 }
 0x379   :  { %1307 = vst [vmem:[#allocation5 + $0x200] sm:$0xff] %v1179_v54  ;;  %v1568_v54 = vld [vmem:[#allocation2 + $0x2f8] sm:$0xff] }
 0x37a   :  { %1308 = vst [vmem:[#allocation5 + $0x208] sm:$0xff] %v1180_v4 }
 0x37c   :  { %1015 = vperm.xlu2 %1445, %v1948_v49  }
 0x37d   :  { %1022 = vperm.xlu1 %1446, %v1957_v2  }
 0x37f   :  { %v918_v60 = vpop.permute.xlu1 %917 }
 0x380   :  { %v1177_v63 = vmul.f32 %v1545_v62, %v918_v60  ;;  %v1178_v30 = vmul.f32 %v1546_v17, %v918_v60  ;;  %v1569_v60 = vld [vmem:[#allocation2 + $0x2e0] sm:$0xff] }
 0x382   :  { %1305 = vst [vmem:[#allocation5 + $0x1f0] sm:$0xff] %v1177_v63  ;;  %v1570_v63 = vld [vmem:[#allocation2 + $0x2e8] sm:$0xff] }
 0x383   :  { %1306 = vst [vmem:[#allocation5 + $0x1f8] sm:$0xff] %v1178_v30 }
 0x384   :  { %1448 = vset.pattern.permute.xlu2 %v1877_v58 }
 0x385   :  { %1449 = vset.pattern.permute.xlu1 %v1891_v14 }
 0x386   :  { %v943_v0 = vpop.permute.xlu2 %942 }
 0x387   :  { %v1185_v3 = vmul.f32 %v1547_v1, %v943_v0  ;;  %v1186_v6 = vmul.f32 %v1548_v5, %v943_v0  ;;  %v1572_v0 = vld [vmem:[#allocation2 + $0x328] sm:$0xff]  ;;  %v1573_v5 = vld [vmem:[#allocation2 + $0x300] sm:$0xff] }
 0x389   :  { %1313 = vst [vmem:[#allocation5 + $0x230] sm:$0xff] %v1185_v3 }
 0x38a   :  { %1314 = vst [vmem:[#allocation5 + $0x238] sm:$0xff] %v1186_v6 }
 0x38c   :  { %1034 = vperm.xlu2 %1448, %v1957_v2  }
 0x38d   :  { %1040 = vperm.xlu1 %1449, %v1957_v2  }
 0x38f   :  { %v931_v49 = vpop.permute.xlu1 %930 }
 0x390   :  { %v1181_v9 = vmul.f32 %v1549_v7, %v931_v49  ;;  %v1182_v11 = vmul.f32 %v1550_v23, %v931_v49  ;;  %v1574_v49 = vld [vmem:[#allocation2 + $0x308] sm:$0xff] }
 0x392   :  { %1309 = vst [vmem:[#allocation5 + $0x210] sm:$0xff] %v1181_v9  ;;  %v1575_v9 = vld [vmem:[#allocation2 + $0x340] sm:$0xff] }
 0x393   :  { %1310 = vst [vmem:[#allocation5 + $0x218] sm:$0xff] %v1182_v11  ;;  %v1576_v11 = vld [vmem:[#allocation2 + $0x348] sm:$0xff] }
 0x394   :  { %1450 = vset.pattern.permute.xlu2 %v1894_v16 }
 0x395   :  { %1451 = vset.pattern.permute.xlu1 %v1904_v20 }
 0x396   :  { %v955_v14 = vpop.permute.xlu2 %954 }
 0x397   :  { %v1189_v13 = vmul.f32 %v1551_v12, %v955_v14  ;;  %v1190_v18 = vmul.f32 %v1552_v31, %v955_v14 }
 0x399   :  { %1317 = vst [vmem:[#allocation5 + $0x250] sm:$0xff] %v1189_v13  ;;  %v1577_v13 = vld [vmem:[#allocation2 + $0x330] sm:$0xff] }
 0x39a   :  { %1318 = vst [vmem:[#allocation5 + $0x258] sm:$0xff] %v1190_v18  ;;  %v1578_v18 = vld [vmem:[#allocation2 + $0x338] sm:$0xff] }
 0x39c   :  { %1046 = vperm.xlu2 %1450, %v1957_v2  }
 0x39d   :  { %1052 = vperm.xlu1 %1451, %v1957_v2  }
 0x39f   :  { %v949_v22 = vpop.permute.xlu1 %948 }
 0x3a0   :  { %v1187_v27 = vmul.f32 %v1553_v24, %v949_v22  ;;  %v1188_v26 = vmul.f32 %v1554_v25, %v949_v22 }
 0x3a2   :  { %1315 = vst [vmem:[#allocation5 + $0x240] sm:$0xff] %v1187_v27  ;;  %v1579_v27 = vld [vmem:[#allocation2 + $0x370] sm:$0xff] }
 0x3a3   :  { %1316 = vst [vmem:[#allocation5 + $0x248] sm:$0xff] %v1188_v26  ;;  %v1580_v26 = vld [vmem:[#allocation2 + $0x378] sm:$0xff] }
 0x3a4   :  { %1453 = vset.pattern.permute.xlu2 %v1910_v8 }
 0x3a5   :  { %1454 = vset.pattern.permute.xlu1 %v1873_v57 }
 0x3a6   :  { %v974_v28 = vpop.permute.xlu2 %973 }
 0x3a7   :  { %v1195_v34 = vmul.f32 %v1555_v32, %v974_v28  ;;  %v1196_v10 = vmul.f32 %v1556_v35, %v974_v28 }
 0x3a9   :  { %1323 = vst [vmem:[#allocation5 + $0x280] sm:$0xff] %v1195_v34  ;;  %v1581_v34 = vld [vmem:[#allocation2 + $0x350] sm:$0xff] }
 0x3aa   :  { %1324 = vst [vmem:[#allocation5 + $0x288] sm:$0xff] %v1196_v10  ;;  %v1582_v10 = vld [vmem:[#allocation2 + $0x358] sm:$0xff] }
 0x3ac   :  { %1064 = vperm.xlu2 %1453, %v1957_v2  }
 0x3ad   :  { %1071 = vperm.xlu1 %1454, %v1972_v42  }
 0x3af   :  { %v961_v36 = vpop.permute.xlu1 %960 }
 0x3b0   :  { %v1191_v37 = vmul.f32 %v1557_v29, %v961_v36  ;;  %v1192_v40 = vmul.f32 %v1558_v38, %v961_v36 }
 0x3b2   :  { %1319 = vst [vmem:[#allocation5 + $0x260] sm:$0xff] %v1191_v37  ;;  %v1583_v37 = vld [vmem:[#allocation2 + $0x390] sm:$0xff] }
 0x3b3   :  { %1320 = vst [vmem:[#allocation5 + $0x268] sm:$0xff] %v1192_v40  ;;  %v1584_v40 = vld [vmem:[#allocation2 + $0x398] sm:$0xff] }
 0x3b4   :  { %1455 = vset.pattern.permute.xlu2 %v1880_v59  ;;  %v1563_v59 = vld [vmem:[#allocation2 + $0x2d0] sm:$0xff] }
 0x3b5   :  { %1456 = vset.pattern.permute.xlu1 %v1877_v58 }
 0x3b6   :  { %v986_v57 = vpop.permute.xlu2 %985 }
 0x3b7   :  { %v1199_v15 = vmul.f32 %v1559_v33, %v986_v57  ;;  %v1200_v43 = vmul.f32 %v1560_v41, %v986_v57 }
 0x3b9   :  { %1327 = vst [vmem:[#allocation5 + $0x2a0] sm:$0xff] %v1199_v15  ;;  %v1585_v15 = vld [vmem:[#allocation2 + $0x380] sm:$0xff] }
 0x3ba   :  { %1328 = vst [vmem:[#allocation5 + $0x2a8] sm:$0xff] %v1200_v43  ;;  %v1586_v43 = vld [vmem:[#allocation2 + $0x388] sm:$0xff] }
 0x3bc   :  { %1077 = vperm.xlu2 %1455, %v1972_v42  }
 0x3bd   :  { %1083 = vperm.xlu1 %1456, %v1972_v42  }
 0x3bf   :  { %v980_v2 = vpop.permute.xlu1 %979 }
 0x3c0   :  { %v1197_v45 = vmul.f32 %v1561_v44, %v980_v2  ;;  %v1198_v47 = vmul.f32 %v1562_v46, %v980_v2 }
 0x3c2   :  { %1325 = vst [vmem:[#allocation5 + $0x290] sm:$0xff] %v1197_v45  ;;  %v1587_v45 = vld [vmem:[#allocation2 + $0x3c0] sm:$0xff] }
 0x3c3   :  { %1326 = vst [vmem:[#allocation5 + $0x298] sm:$0xff] %v1198_v47  ;;  %v1588_v47 = vld [vmem:[#allocation2 + $0x3c8] sm:$0xff] }
 0x3c4   :  { %1458 = vset.pattern.permute.xlu2 %v1894_v16 }
 0x3c5   :  { %1459 = vset.pattern.permute.xlu1 %v1904_v20  ;;  %v1567_v20 = vld [vmem:[#allocation2 + $0x2f0] sm:$0xff] }
 0x3c6   :  { %v1004_v58 = vpop.permute.xlu2 %1003 }
 0x3c7   :  { %v1205_v39 = vmul.f32 %v1563_v59, %v1004_v58  ;;  %v1206_v50 = vmul.f32 %v1564_v48, %v1004_v58 }
 0x3c9   :  { %1333 = vst [vmem:[#allocation5 + $0x2d0] sm:$0xff] %v1205_v39  ;;  %v1589_v39 = vld [vmem:[#allocation2 + $0x3a0] sm:$0xff] }
 0x3ca   :  { %1334 = vst [vmem:[#allocation5 + $0x2d8] sm:$0xff] %v1206_v50  ;;  %v1590_v50 = vld [vmem:[#allocation2 + $0x3a8] sm:$0xff] }
 0x3cc   :  { %1095 = vperm.xlu2 %1458, %v1972_v42  }
 0x3cd   :  { %1101 = vperm.xlu1 %1459, %v1972_v42  }
 0x3cf   :  { %v992_v61 = vpop.permute.xlu1 %991 }
 0x3d0   :  { %v1201_v52 = vmul.f32 %v1565_v51, %v992_v61  ;;  %v1202_v21 = vmul.f32 %v1566_v53, %v992_v61 }
 0x3d2   :  { %1329 = vst [vmem:[#allocation5 + $0x2b0] sm:$0xff] %v1201_v52  ;;  %v1591_v52 = vld [vmem:[#allocation2 + $0x3e0] sm:$0xff] }
 0x3d3   :  { %1330 = vst [vmem:[#allocation5 + $0x2b8] sm:$0xff] %v1202_v21  ;;  %v1592_v21 = vld [vmem:[#allocation2 + $0x3e8] sm:$0xff] }
 0x3d4   :  { %1460 = vset.pattern.permute.xlu2 %v1901_v19 }
 0x3d5   :  { %1461 = vset.pattern.permute.xlu1 %v1910_v8  ;;  %v1571_v8 = vld [vmem:[#allocation2 + $0x320] sm:$0xff] }
 0x3d6   :  { %v1016_v16 = vpop.permute.xlu2 %1015 }
 0x3d7   :  { %v1209_v55 = vmul.f32 %v1567_v20, %v1016_v16  ;;  %v1210_v56 = vmul.f32 %v1568_v54, %v1016_v16 }
 0x3d9   :  { %1337 = vst [vmem:[#allocation5 + $0x2f0] sm:$0xff] %v1209_v55  ;;  %v1593_v55 = vld [vmem:[#allocation2 + $0x3d0] sm:$0xff] }
 0x3da   :  { %1338 = vst [vmem:[#allocation5 + $0x2f8] sm:$0xff] %v1210_v56  ;;  %v1594_v56 = vld [vmem:[#allocation2 + $0x3d8] sm:$0xff] }
 0x3dc   :  { %1107 = vperm.xlu2 %1460, %v1972_v42  }
 0x3dd   :  { %1113 = vperm.xlu1 %1461, %v1972_v42  }
 0x3df   :  { %v1010_v4 = vpop.permute.xlu1 %1009 }
 0x3e0   :  { %v1207_v62 = vmul.f32 %v1569_v60, %v1010_v4  ;;  %v1208_v17 = vmul.f32 %v1570_v63, %v1010_v4 }
 0x3e2   :  { %1335 = vst [vmem:[#allocation5 + $0x2e0] sm:$0xff] %v1207_v62  ;;  %v1595_v62 = vld [vmem:[#allocation2 + $0x3f0] sm:$0xff] }
 0x3e3   :  { %1336 = vst [vmem:[#allocation5 + $0x2e8] sm:$0xff] %v1208_v17  ;;  %v1596_v17 = vld [vmem:[#allocation2 + $0x3f8] sm:$0xff] }
 0x3e6   :  { %v1035_v19 = vpop.permute.xlu2 %1034 }
 0x3e7   :  { %v1215_v30 = vmul.f32 %v1571_v8, %v1035_v19  ;;  %v1216_v1 = vmul.f32 %v1572_v0, %v1035_v19 }
 0x3e9   :  { %1343 = vst [vmem:[#allocation5 + $0x320] sm:$0xff] %v1215_v30 }
 0x3ea   :  { %1344 = vst [vmem:[#allocation5 + $0x328] sm:$0xff] %v1216_v1 }
 0x3ef   :  { %v1023_v3 = vpop.permute.xlu1 %1022 }
 0x3f0   :  { %v1211_v6 = vmul.f32 %v1573_v5, %v1023_v3  ;;  %v1212_v7 = vmul.f32 %v1574_v49, %v1023_v3 }
 0x3f2   :  { %1339 = vst [vmem:[#allocation5 + $0x300] sm:$0xff] %v1211_v6 }
 0x3f3   :  { %1340 = vst [vmem:[#allocation5 + $0x308] sm:$0xff] %v1212_v7 }
 0x3f6   :  { %v1047_v42 = vpop.permute.xlu2 %1046 }
 0x3f7   :  { %v1219_v23 = vmul.f32 %v1575_v9, %v1047_v42  ;;  %v1220_v14 = vmul.f32 %v1576_v11, %v1047_v42 }
 0x3f9   :  { %1347 = vst [vmem:[#allocation5 + $0x340] sm:$0xff] %v1219_v23 }
 0x3fa   :  { %1348 = vst [vmem:[#allocation5 + $0x348] sm:$0xff] %v1220_v14 }
 0x3ff   :  { %v1041_v12 = vpop.permute.xlu1 %1040 }
 0x400   :  { %v1217_v31 = vmul.f32 %v1577_v13, %v1041_v12  ;;  %v1218_v22 = vmul.f32 %v1578_v18, %v1041_v12 }
 0x402   :  { %1345 = vst [vmem:[#allocation5 + $0x330] sm:$0xff] %v1217_v31 }
 0x403   :  { %1346 = vst [vmem:[#allocation5 + $0x338] sm:$0xff] %v1218_v22 }
 0x406   :  { %v1065_v24 = vpop.permute.xlu2 %1064 }
 0x407   :  { %v1225_v25 = vmul.f32 %v1579_v27, %v1065_v24  ;;  %v1226_v28 = vmul.f32 %v1580_v26, %v1065_v24 }
 0x409   :  { %1353 = vst [vmem:[#allocation5 + $0x370] sm:$0xff] %v1225_v25 }
 0x40a   :  { %1354 = vst [vmem:[#allocation5 + $0x378] sm:$0xff] %v1226_v28 }
 0x40f   :  { %v1053_v32 = vpop.permute.xlu1 %1052 }
 0x410   :  { %v1221_v35 = vmul.f32 %v1581_v34, %v1053_v32  ;;  %v1222_v36 = vmul.f32 %v1582_v10, %v1053_v32 }
 0x412   :  { %1349 = vst [vmem:[#allocation5 + $0x350] sm:$0xff] %v1221_v35 }
 0x413   :  { %1350 = vst [vmem:[#allocation5 + $0x358] sm:$0xff] %v1222_v36 }
 0x416   :  { %v1078_v29 = vpop.permute.xlu2 %1077 }
 0x417   :  { %v1229_v38 = vmul.f32 %v1583_v37, %v1078_v29  ;;  %v1230_v57 = vmul.f32 %v1584_v40, %v1078_v29 }
 0x419   :  { %1357 = vst [vmem:[#allocation5 + $0x390] sm:$0xff] %v1229_v38 }
 0x41a   :  { %1358 = vst [vmem:[#allocation5 + $0x398] sm:$0xff] %v1230_v57 }
 0x41f   :  { %v1072_v33 = vpop.permute.xlu1 %1071 }
 0x420   :  { %v1227_v41 = vmul.f32 %v1585_v15, %v1072_v33  ;;  %v1228_v2 = vmul.f32 %v1586_v43, %v1072_v33 }
 0x422   :  { %1355 = vst [vmem:[#allocation5 + $0x380] sm:$0xff] %v1227_v41 }
 0x423   :  { %1356 = vst [vmem:[#allocation5 + $0x388] sm:$0xff] %v1228_v2 }
 0x426   :  { %v1096_v44 = vpop.permute.xlu2 %1095 }
 0x427   :  { %v1235_v46 = vmul.f32 %v1587_v45, %v1096_v44  ;;  %v1236_v58 = vmul.f32 %v1588_v47, %v1096_v44 }
 0x429   :  { %1363 = vst [vmem:[#allocation5 + $0x3c0] sm:$0xff] %v1235_v46 }
 0x42a   :  { %1364 = vst [vmem:[#allocation5 + $0x3c8] sm:$0xff] %v1236_v58 }
 0x42f   :  { %v1084_v59 = vpop.permute.xlu1 %1083 }
 0x430   :  { %v1231_v48 = vmul.f32 %v1589_v39, %v1084_v59  ;;  %v1232_v61 = vmul.f32 %v1590_v50, %v1084_v59 }
 0x432   :  { %1359 = vst [vmem:[#allocation5 + $0x3a0] sm:$0xff] %v1231_v48 }
 0x433   :  { %1360 = vst [vmem:[#allocation5 + $0x3a8] sm:$0xff] %v1232_v61 }
 0x436   :  { %v1108_v51 = vpop.permute.xlu2 %1107 }
 0x437   :  { %v1239_v53 = vmul.f32 %v1591_v52, %v1108_v51  ;;  %v1240_v16 = vmul.f32 %v1592_v21, %v1108_v51 }
 0x439   :  { %1367 = vst [vmem:[#allocation5 + $0x3e0] sm:$0xff] %v1239_v53 }
 0x43a   :  { %1368 = vst [vmem:[#allocation5 + $0x3e8] sm:$0xff] %v1240_v16 }
 0x43f   :  { %v1102_v20 = vpop.permute.xlu1 %1101 }
 0x440   :  { %v1237_v54 = vmul.f32 %v1593_v55, %v1102_v20  ;;  %v1238_v4 = vmul.f32 %v1594_v56, %v1102_v20 }
 0x442   :  { %1365 = vst [vmem:[#allocation5 + $0x3d0] sm:$0xff] %v1237_v54 }
 0x443   :  { %1366 = vst [vmem:[#allocation5 + $0x3d8] sm:$0xff] %v1238_v4 }
 0x44f   :  { %v1114_v60 = vpop.permute.xlu1 %1113 }
 0x450   :  { %v1241_v63 = vmul.f32 %v1595_v62, %v1114_v60  ;;  %v1242_v19 = vmul.f32 %v1596_v17, %v1114_v60 }
 0x452   :  { %1369 = vst [vmem:[#allocation5 + $0x3f0] sm:$0xff] %v1241_v63 }
 0x453   :  { %1370 = vst [vmem:[#allocation5 + $0x3f8] sm:$0xff] %v1242_v19 }
 0x454   :  { %1383 = dma.vmem_to_hbm [thread:$0]  %s1376_s18, 16384, %s1378_s21, [#allocation4], %s1650_s23, %s1650_s23, %s1651_s24  }
 0x455   :  { %1647 = dma.done.wait [#allocation4], 16384  }
 0x456   :  { %1648 = vsyncadd [#allocation4], 4294950912 }
 0x457   :  { %1388 = vsyncpa [#allocation3], 1 }
 0x458   :  { %1389 = vsyncpa [#allocation4], 1 }

</bundles_post_ra>
